<compile_context>
chip_gen: v7x
topology: tpu7x:2x2x1
jax: 0.10.0
libtpu: 0.0.40
codegen_flags: <defaults>
</compile_context>

<pallas_src>
import functools

import numpy as np
import jax
import jax.numpy as jnp
from jax.experimental import pallas as pl
from jax.experimental.pallas import tpu as pltpu

BN_EPS = 1e-5


# ---------------------------------------------------------------------------
# Fused kernel: (conv -> BN(batch stats) -> ReLU) x 2, everything in VMEM.
# Layouts: activations (rows = (n, h), lanes = (w, c)); H-padded scratches
# have rows = (n, h_padded).
# ---------------------------------------------------------------------------
def block_kernel(x_ref, w1b_ref, w2b_ref, g1_ref, b1_ref, g2_ref, b2_ref,
                 out_ref, xpad_ref, ypad_ref, acc_ref,
                 *, N, H, W, Cin, Cout, KH, pad, compute_dtype):
    f32 = jnp.float32
    Hp = H + 2 * pad
    L = W * Cout                 # lane width of conv outputs
    count = float(N * H * W)     # elements per channel for BatchNorm stats

    # 0/1 channel-projection matrix: right-multiplying by it sums each
    # channel's per-w partials over w and broadcasts the per-channel total
    # back to every (w, c) lane.  Runs on the MXU; keeps stats lane-dense.
    li = jax.lax.broadcasted_iota(jnp.int32, (L, L), 0)
    lj = jax.lax.broadcasted_iota(jnp.int32, (L, L), 1)
    proj = ((li % Cout) == (lj % Cout)).astype(f32)

    def conv(src_ref, wb_ref):
        # src_ref: (N*Hp, W*Cin_l) f32 H-zero-padded activations
        # wb_ref : (KH, W*Cin_l, L) band weights (W zero-pad encoded as zeros)
        for n in range(N):
            acc = jnp.zeros((H, L), f32)
            for i in range(KH):
                r0 = n * Hp + i
                lhs = src_ref[r0:r0 + H, :].astype(compute_dtype)
                acc = acc + jnp.dot(lhs, wb_ref[i],
                                    preferred_element_type=f32)
            acc_ref[n * H:(n + 1) * H, :] = acc

    def bn_scale_shift(acc, g_ref, b_ref):
        # Two-pass (centered) batch statistics, all f32.
        colsum = jnp.sum(acc, axis=0, keepdims=True)                    # (1,L)
        mean = jnp.dot(colsum, proj, preferred_element_type=f32) / count
        d = acc - mean
        sqsum = jnp.sum(d * d, axis=0, keepdims=True)                   # (1,L)
        var = jnp.dot(sqsum, proj, preferred_element_type=f32) / count
        scale = g_ref[...] * jax.lax.rsqrt(var + BN_EPS)
        shift = b_ref[...] - mean * scale
        return scale, shift

    # ------------------- layer 1: conv1 -> BN1 -> ReLU -------------------
    xpad_ref[...] = jnp.zeros((N * Hp, W * Cin), f32)
    for n in range(N):
        xpad_ref[n * Hp + pad:n * Hp + pad + H, :] = x_ref[n * H:(n + 1) * H, :]
    conv(xpad_ref, w1b_ref)

    acc1 = acc_ref[...]
    s1, t1 = bn_scale_shift(acc1, g1_ref, b1_ref)
    ypad_ref[...] = jnp.zeros((N * Hp, L), f32)
    for n in range(N):
        ypad_ref[n * Hp + pad:n * Hp + pad + H, :] = jnp.maximum(
            acc1[n * H:(n + 1) * H, :] * s1 + t1, 0.0)

    # ------------------- layer 2: conv2 -> BN2 -> ReLU -------------------
    conv(ypad_ref, w2b_ref)
    acc2 = acc_ref[...]
    s2, t2 = bn_scale_shift(acc2, g2_ref, b2_ref)
    out_ref[...] = jnp.maximum(acc2 * s2 + t2, 0.0)       # lane-dense f32 store


# ---------------------------------------------------------------------------
# Weight-side prep (tiny, one einsum per conv): PyTorch (Cout,Cin,KH,KW) conv
# weight -> (KH, W*Cin, W*Cout) band matrices for the lane-packed layout.
# ---------------------------------------------------------------------------
def band_weights(w_oihw, W_img):
    Cout, Cin, KH, KW = w_oihw.shape
    pad = (KW - 1) // 2
    # D[j, w_in, w_out] = 1 iff w_in == w_out + j - pad  (compile-time const).
    D = np.zeros((KW, W_img, W_img), np.float32)
    for j in range(KW):
        for wo in range(W_img):
            wi = wo + j - pad
            if 0 <= wi < W_img:
                D[j, wi, wo] = 1.0
    band = jnp.einsum('jab,ocij->iacbo', jnp.asarray(D), w_oihw)
    return band.reshape(KH, W_img * Cin, W_img * Cout)


# ---------------------------------------------------------------------------
# Block forward (matches the PyTorch module's forward, NCHW in / NCHW out)
# ---------------------------------------------------------------------------
@functools.partial(jax.jit, static_argnames=("compute_dtype",))
def block_forward(x_nchw, params, compute_dtype=jnp.bfloat16):
    w1, g1, b1, w2, g2, b2 = params
    N, Cin, H, W = x_nchw.shape
    Cout, _, KH, KW = w1.shape
    pad = (KW - 1) // 2
    assert KH == KW and 2 * pad == KH - 1, "kernel assumes 'same' stride-1 conv"
    L = W * Cout
    Hp = H + 2 * pad

    # Activation path: only the interface transpose remains (im2col is gone).
    x2d = jnp.transpose(x_nchw, (0, 2, 3, 1)).reshape(N * H, W * Cin)
    x2d = x2d.astype(jnp.float32)

    # Band weights + BN affine params tiled into the same (w, c) lane order.
    w1b = band_weights(w1, W).astype(compute_dtype)        # (KH, W*Cin, L)
    w2b = band_weights(w2, W).astype(compute_dtype)        # (KH, L,     L)
    g1l = jnp.tile(g1.astype(jnp.float32), W).reshape(1, L)
    b1l = jnp.tile(b1.astype(jnp.float32), W).reshape(1, L)
    g2l = jnp.tile(g2.astype(jnp.float32), W).reshape(1, L)
    b2l = jnp.tile(b2.astype(jnp.float32), W).reshape(1, L)

    kernel = functools.partial(
        block_kernel, N=N, H=H, W=W, Cin=Cin, Cout=Cout, KH=KH, pad=pad,
        compute_dtype=compute_dtype)

    out2d = pl.pallas_call(
        kernel,
        out_shape=jax.ShapeDtypeStruct((N * H, L), jnp.float32),
        grid=(1,),
        in_specs=[
            pl.BlockSpec((N * H, W * Cin), lambda i: (0, 0)),     # x
            pl.BlockSpec((KH, W * Cin, L), lambda i: (0, 0, 0)),  # conv1 band
            pl.BlockSpec((KH, L, L), lambda i: (0, 0, 0)),        # conv2 band
            pl.BlockSpec((1, L), lambda i: (0, 0)),               # gamma1
            pl.BlockSpec((1, L), lambda i: (0, 0)),               # beta1
            pl.BlockSpec((1, L), lambda i: (0, 0)),               # gamma2
            pl.BlockSpec((1, L), lambda i: (0, 0)),               # beta2
        ],
        out_specs=pl.BlockSpec((N * H, L), lambda i: (0, 0)),
        scratch_shapes=[
            pltpu.VMEM((N * Hp, W * Cin), jnp.float32),   # H-padded input
            pltpu.VMEM((N * Hp, L), jnp.float32),         # H-padded y1
            pltpu.VMEM((N * H, L), jnp.float32),          # conv accumulator
        ],
        compiler_params=pltpu.CompilerParams(
            dimension_semantics=("arbitrary",),
            vmem_limit_bytes=32 * 1024 * 1024,
        ),
    )(x2d, w1b, w2b, g1l, b1l, g2l, b2l)

    return jnp.transpose(out2d.reshape(N, H, W, Cout), (0, 3, 1, 2))


# ---------------------------------------------------------------------------
# Pure-JAX reference (training-mode BatchNorm, i.e. batch statistics)
# ---------------------------------------------------------------------------
def reference_forward(x_nchw, params, padding=1):
    w1, g1, b1, w2, g2, b2 = params

    def conv_bn_relu_ref(x, w, g, b):
        y = jax.lax.conv_general_dilated(
            x, w, window_strides=(1, 1), padding=[(padding, padding)] * 2,
            dimension_numbers=("NCHW", "OIHW", "NCHW"))
        mean = jnp.mean(y, axis=(0, 2, 3), keepdims=True)
        var = jnp.mean((y - mean) ** 2, axis=(0, 2, 3), keepdims=True)
        y = (y - mean) * jax.lax.rsqrt(var + BN_EPS)
        y = y * g.reshape(1, -1, 1, 1) + b.reshape(1, -1, 1, 1)
        return jnp.maximum(y, 0.0)

    return conv_bn_relu_ref(conv_bn_relu_ref(x_nchw, w1, g1, b1), w2, g2, b2)


if __name__ == "__main__":
    # Block(in_channels=4, out_channels=8, kernel_size=3, padding=1, bias=False)
    N, Cin, H, W = 2, 4, 16, 16
    Cout, KS = 8, 3

    key = jax.random.PRNGKey(0)
    k1, k2, k3, k4, k5, k6, k7 = jax.random.split(key, 7)
    w1 = jax.random.normal(k1, (Cout, Cin, KS, KS), jnp.float32) * 0.1
    w2 = jax.random.normal(k2, (Cout, Cout, KS, KS), jnp.float32) * 0.1
    # Mildly perturbed BN affine params (exercise gamma/beta handling).
    g1 = 1.0 + 0.05 * jax.random.normal(k4, (Cout,), jnp.float32)
    b1 = 0.05 * jax.random.normal(k5, (Cout,), jnp.float32)
    g2 = 1.0 + 0.05 * jax.random.normal(k6, (Cout,), jnp.float32)
    b2 = 0.05 * jax.random.normal(k7, (Cout,), jnp.float32)
    params = (w1, g1, b1, w2, g2, b2)

    x = jax.random.normal(k3, (N, Cin, H, W), jnp.float32)
    ref = reference_forward(x, params)

    # 1) f32 matmul path: tight structural check vs the pure-JAX reference.
    out_f32 = jax.block_until_ready(
        block_forward(x, params, compute_dtype=jnp.float32))
    assert out_f32.shape == (N, Cout, H, W)
    assert jnp.allclose(out_f32, ref, rtol=1e-4, atol=1e-4), "f32 mismatch"

    # 2) bf16 matmul operands (the performance configuration); BN statistics
    #    and normalization stay f32, so tolerance is bounded by input rounding.
    out_bf16 = jax.block_until_ready(block_forward(x, params))
    assert out_bf16.shape == (N, Cout, H, W)
    assert jnp.allclose(out_bf16, ref, rtol=6e-2, atol=6e-2), "bf16 mismatch"

    print("KERNEL_OK")
</pallas_src>

<mosaic_0001>
module attributes {stable_mosaic.version = 11 : i64} {
  func.func @block_kernel(%arg0: i32, %arg1: memref<32x64xf32, #tpu.memory_space<vmem>>, %arg2: memref<3x64x128xf32, #tpu.memory_space<vmem>>, %arg3: memref<3x128x128xf32, #tpu.memory_space<vmem>>, %arg4: memref<1x128xf32, #tpu.memory_space<vmem>>, %arg5: memref<1x128xf32, #tpu.memory_space<vmem>>, %arg6: memref<1x128xf32, #tpu.memory_space<vmem>>, %arg7: memref<1x128xf32, #tpu.memory_space<vmem>>, %arg8: memref<32x128xf32, #tpu.memory_space<vmem>>, %arg9: memref<36x64xf32, #tpu.memory_space<vmem>>, %arg10: memref<36x128xf32, #tpu.memory_space<vmem>>, %arg11: memref<32x128xf32, #tpu.memory_space<vmem>>) attributes {dimension_semantics = [#tpu.dimension_semantics<arbitrary>], iteration_bounds = array<i64: 1>, scalar_prefetch = 0 : i64, scratch_operands = 3 : i64, tpu.core_type = #tpu.core_type<tc>, window_params = [{pipeline_mode = #tpu.pipeline_mode<synchronous>, transform_indices = @transform_0, window_bounds = array<i64: 32, 64>}, {pipeline_mode = #tpu.pipeline_mode<synchronous>, transform_indices = @transform_1, window_bounds = array<i64: 3, 64, 128>}, {pipeline_mode = #tpu.pipeline_mode<synchronous>, transform_indices = @transform_2, window_bounds = array<i64: 3, 128, 128>}, {pipeline_mode = #tpu.pipeline_mode<synchronous>, transform_indices = @transform_3, window_bounds = array<i64: 1, 128>}, {pipeline_mode = #tpu.pipeline_mode<synchronous>, transform_indices = @transform_4, window_bounds = array<i64: 1, 128>}, {pipeline_mode = #tpu.pipeline_mode<synchronous>, transform_indices = @transform_5, window_bounds = array<i64: 1, 128>}, {pipeline_mode = #tpu.pipeline_mode<synchronous>, transform_indices = @transform_6, window_bounds = array<i64: 1, 128>}, {pipeline_mode = #tpu.pipeline_mode<synchronous>, transform_indices = @transform_7, window_bounds = array<i64: 32, 128>}]} {
    %0 = tpu.iota {dimensions = array<i32: 0>} : vector<128x128xi32>
    %1 = tpu.iota {dimensions = array<i32: 1>} : vector<128x128xi32>
    %c8_i32 = arith.constant 8 : i32
    %c0_i32 = arith.constant 0 : i32
    %2 = arith.cmpi eq, %c8_i32, %c0_i32 : i32
    %c1_i32 = arith.constant 1 : i32
    %3 = arith.select %2, %c1_i32, %c8_i32 : i32
    %4 = vector.broadcast %3 : i32 to vector<128x128xi32>
    %5 = arith.remsi %0, %4 : vector<128x128xi32>
    %c0_i32_0 = arith.constant 0 : i32
    %6 = vector.broadcast %c0_i32_0 : i32 to vector<128x128xi32>
    %7 = arith.cmpi ne, %5, %6 : vector<128x128xi32>
    %c0_i32_1 = arith.constant 0 : i32
    %8 = vector.broadcast %c0_i32_1 : i32 to vector<128x128xi32>
    %9 = arith.cmpi slt, %5, %8 : vector<128x128xi32>
    %c0_i32_2 = arith.constant 0 : i32
    %10 = arith.cmpi slt, %3, %c0_i32_2 : i32
    %11 = vector.broadcast %10 : i1 to vector<128x128xi1>
    %12 = vector.broadcast %11 : vector<128x128xi1> to vector<128x128xi1>
    %13 = arith.xori %9, %12 : vector<128x128xi1>
    %14 = arith.andi %13, %7 : vector<128x128xi1>
    %15 = vector.broadcast %3 : i32 to vector<128x128xi32>
    %16 = arith.addi %5, %15 : vector<128x128xi32>
    %17 = arith.select %14, %16, %5 : vector<128x128xi1>, vector<128x128xi32>
    %c8_i32_3 = arith.constant 8 : i32
    %c0_i32_4 = arith.constant 0 : i32
    %18 = arith.cmpi eq, %c8_i32_3, %c0_i32_4 : i32
    %c1_i32_5 = arith.constant 1 : i32
    %19 = arith.select %18, %c1_i32_5, %c8_i32_3 : i32
    %20 = vector.broadcast %19 : i32 to vector<128x128xi32>
    %21 = arith.remsi %1, %20 : vector<128x128xi32>
    %c0_i32_6 = arith.constant 0 : i32
    %22 = vector.broadcast %c0_i32_6 : i32 to vector<128x128xi32>
    %23 = arith.cmpi ne, %21, %22 : vector<128x128xi32>
    %c0_i32_7 = arith.constant 0 : i32
    %24 = vector.broadcast %c0_i32_7 : i32 to vector<128x128xi32>
    %25 = arith.cmpi slt, %21, %24 : vector<128x128xi32>
    %c0_i32_8 = arith.constant 0 : i32
    %26 = arith.cmpi slt, %19, %c0_i32_8 : i32
    %27 = vector.broadcast %26 : i1 to vector<128x128xi1>
    %28 = vector.broadcast %27 : vector<128x128xi1> to vector<128x128xi1>
    %29 = arith.xori %25, %28 : vector<128x128xi1>
    %30 = arith.andi %29, %23 : vector<128x128xi1>
    %31 = vector.broadcast %19 : i32 to vector<128x128xi32>
    %32 = arith.addi %21, %31 : vector<128x128xi32>
    %33 = arith.select %30, %32, %21 : vector<128x128xi1>, vector<128x128xi32>
    %34 = arith.cmpi eq, %17, %33 : vector<128x128xi32>
    %35 = arith.extui %34 : vector<128x128xi1> to vector<128x128xi32>
    %36 = arith.sitofp %35 : vector<128x128xi32> to vector<128x128xf32>
    %cst = arith.constant 0.000000e+00 : f32
    %37 = vector.broadcast %cst : f32 to vector<36x64xf32>
    %c0 = arith.constant 0 : index
    %c0_9 = arith.constant 0 : index
    %38 = vector.load %arg9[%c0, %c0_9] : memref<36x64xf32, #tpu.memory_space<vmem>>, vector<36x64xf32>
    tpu.vector_store %arg9[%c0, %c0_9], %37 {strides = array<i32>} : memref<36x64xf32, #tpu.memory_space<vmem>>, vector<36x64xf32>,
    %c0_10 = arith.constant 0 : index
    %c0_11 = arith.constant 0 : index
    %39 = vector.load %arg1[%c0_10, %c0_11] : memref<32x64xf32, #tpu.memory_space<vmem>>, vector<16x64xf32>
    %c1 = arith.constant 1 : index
    %c0_12 = arith.constant 0 : index
    %40 = vector.load %arg9[%c1, %c0_12] : memref<36x64xf32, #tpu.memory_space<vmem>>, vector<16x64xf32>
    tpu.vector_store %arg9[%c1, %c0_12], %39 {strides = array<i32>} : memref<36x64xf32, #tpu.memory_space<vmem>>, vector<16x64xf32>,
    %c16 = arith.constant 16 : index
    %c0_13 = arith.constant 0 : index
    %41 = vector.load %arg1[%c16, %c0_13] : memref<32x64xf32, #tpu.memory_space<vmem>>, vector<16x64xf32>
    %c19 = arith.constant 19 : index
    %c0_14 = arith.constant 0 : index
    %42 = vector.load %arg9[%c19, %c0_14] : memref<36x64xf32, #tpu.memory_space<vmem>>, vector<16x64xf32>
    tpu.vector_store %arg9[%c19, %c0_14], %41 {strides = array<i32>} : memref<36x64xf32, #tpu.memory_space<vmem>>, vector<16x64xf32>,
    %cst_15 = arith.constant 0.000000e+00 : f32
    %43 = vector.broadcast %cst_15 : f32 to vector<16x128xf32>
    %c0_16 = arith.constant 0 : index
    %c0_17 = arith.constant 0 : index
    %44 = vector.load %arg9[%c0_16, %c0_17] : memref<36x64xf32, #tpu.memory_space<vmem>>, vector<16x64xf32>
    %c0_18 = arith.constant 0 : index
    %c0_19 = arith.constant 0 : index
    %c0_20 = arith.constant 0 : index
    %45 = vector.load %arg2[%c0_18, %c0_19, %c0_20] : memref<3x64x128xf32, #tpu.memory_space<vmem>>, vector<1x64x128xf32>
    %46 = vector.shape_cast %45 : vector<1x64x128xf32> to vector<64x128xf32>
    %cst_21 = arith.constant dense<0.000000e+00> : vector<16x128xf32>
    %47 = tpu.matmul %44, %46, %cst_21 {dimension_numbers = #tpu.dot_dimension_numbers<[1], [0], [0], [1], [0, 0, 1, 1], [], []>} : vector<16x64xf32>, vector<64x128xf32>, vector<16x128xf32> -> vector<16x128xf32>
    %48 = arith.addf %43, %47 : vector<16x128xf32>
    %c1_22 = arith.constant 1 : index
    %c0_23 = arith.constant 0 : index
    %49 = vector.load %arg9[%c1_22, %c0_23] : memref<36x64xf32, #tpu.memory_space<vmem>>, vector<16x64xf32>
    %c1_24 = arith.constant 1 : index
    %c0_25 = arith.constant 0 : index
    %c0_26 = arith.constant 0 : index
    %50 = vector.load %arg2[%c1_24, %c0_25, %c0_26] : memref<3x64x128xf32, #tpu.memory_space<vmem>>, vector<1x64x128xf32>
    %51 = vector.shape_cast %50 : vector<1x64x128xf32> to vector<64x128xf32>
    %cst_27 = arith.constant dense<0.000000e+00> : vector<16x128xf32>
    %52 = tpu.matmul %49, %51, %cst_27 {dimension_numbers = #tpu.dot_dimension_numbers<[1], [0], [0], [1], [0, 0, 1, 1], [], []>} : vector<16x64xf32>, vector<64x128xf32>, vector<16x128xf32> -> vector<16x128xf32>
    %53 = arith.addf %48, %52 : vector<16x128xf32>
    %c2 = arith.constant 2 : index
    %c0_28 = arith.constant 0 : index
    %54 = vector.load %arg9[%c2, %c0_28] : memref<36x64xf32, #tpu.memory_space<vmem>>, vector<16x64xf32>
    %c2_29 = arith.constant 2 : index
    %c0_30 = arith.constant 0 : index
    %c0_31 = arith.constant 0 : index
    %55 = vector.load %arg2[%c2_29, %c0_30, %c0_31] : memref<3x64x128xf32, #tpu.memory_space<vmem>>, vector<1x64x128xf32>
    %56 = vector.shape_cast %55 : vector<1x64x128xf32> to vector<64x128xf32>
    %cst_32 = arith.constant dense<0.000000e+00> : vector<16x128xf32>
    %57 = tpu.matmul %54, %56, %cst_32 {dimension_numbers = #tpu.dot_dimension_numbers<[1], [0], [0], [1], [0, 0, 1, 1], [], []>} : vector<16x64xf32>, vector<64x128xf32>, vector<16x128xf32> -> vector<16x128xf32>
    %58 = arith.addf %53, %57 : vector<16x128xf32>
    %c0_33 = arith.constant 0 : index
    %c0_34 = arith.constant 0 : index
    %59 = vector.load %arg11[%c0_33, %c0_34] : memref<32x128xf32, #tpu.memory_space<vmem>>, vector<16x128xf32>
    tpu.vector_store %arg11[%c0_33, %c0_34], %58 {strides = array<i32>} : memref<32x128xf32, #tpu.memory_space<vmem>>, vector<16x128xf32>,
    %cst_35 = arith.constant 0.000000e+00 : f32
    %60 = vector.broadcast %cst_35 : f32 to vector<16x128xf32>
    %c18 = arith.constant 18 : index
    %c0_36 = arith.constant 0 : index
    %61 = vector.load %arg9[%c18, %c0_36] : memref<36x64xf32, #tpu.memory_space<vmem>>, vector<16x64xf32>
    %c0_37 = arith.constant 0 : index
    %c0_38 = arith.constant 0 : index
    %c0_39 = arith.constant 0 : index
    %62 = vector.load %arg2[%c0_37, %c0_38, %c0_39] : memref<3x64x128xf32, #tpu.memory_space<vmem>>, vector<1x64x128xf32>
    %63 = vector.shape_cast %62 : vector<1x64x128xf32> to vector<64x128xf32>
    %cst_40 = arith.constant dense<0.000000e+00> : vector<16x128xf32>
    %64 = tpu.matmul %61, %63, %cst_40 {dimension_numbers = #tpu.dot_dimension_numbers<[1], [0], [0], [1], [0, 0, 1, 1], [], []>} : vector<16x64xf32>, vector<64x128xf32>, vector<16x128xf32> -> vector<16x128xf32>
    %65 = arith.addf %60, %64 : vector<16x128xf32>
    %c19_41 = arith.constant 19 : index
    %c0_42 = arith.constant 0 : index
    %66 = vector.load %arg9[%c19_41, %c0_42] : memref<36x64xf32, #tpu.memory_space<vmem>>, vector<16x64xf32>
    %c1_43 = arith.constant 1 : index
    %c0_44 = arith.constant 0 : index
    %c0_45 = arith.constant 0 : index
    %67 = vector.load %arg2[%c1_43, %c0_44, %c0_45] : memref<3x64x128xf32, #tpu.memory_space<vmem>>, vector<1x64x128xf32>
    %68 = vector.shape_cast %67 : vector<1x64x128xf32> to vector<64x128xf32>
    %cst_46 = arith.constant dense<0.000000e+00> : vector<16x128xf32>
    %69 = tpu.matmul %66, %68, %cst_46 {dimension_numbers = #tpu.dot_dimension_numbers<[1], [0], [0], [1], [0, 0, 1, 1], [], []>} : vector<16x64xf32>, vector<64x128xf32>, vector<16x128xf32> -> vector<16x128xf32>
    %70 = arith.addf %65, %69 : vector<16x128xf32>
    %c20 = arith.constant 20 : index
    %c0_47 = arith.constant 0 : index
    %71 = vector.load %arg9[%c20, %c0_47] : memref<36x64xf32, #tpu.memory_space<vmem>>, vector<16x64xf32>
    %c2_48 = arith.constant 2 : index
    %c0_49 = arith.constant 0 : index
    %c0_50 = arith.constant 0 : index
    %72 = vector.load %arg2[%c2_48, %c0_49, %c0_50] : memref<3x64x128xf32, #tpu.memory_space<vmem>>, vector<1x64x128xf32>
    %73 = vector.shape_cast %72 : vector<1x64x128xf32> to vector<64x128xf32>
    %cst_51 = arith.constant dense<0.000000e+00> : vector<16x128xf32>
    %74 = tpu.matmul %71, %73, %cst_51 {dimension_numbers = #tpu.dot_dimension_numbers<[1], [0], [0], [1], [0, 0, 1, 1], [], []>} : vector<16x64xf32>, vector<64x128xf32>, vector<16x128xf32> -> vector<16x128xf32>
    %75 = arith.addf %70, %74 : vector<16x128xf32>
    %c16_52 = arith.constant 16 : index
    %c0_53 = arith.constant 0 : index
    %76 = vector.load %arg11[%c16_52, %c0_53] : memref<32x128xf32, #tpu.memory_space<vmem>>, vector<16x128xf32>
    tpu.vector_store %arg11[%c16_52, %c0_53], %75 {strides = array<i32>} : memref<32x128xf32, #tpu.memory_space<vmem>>, vector<16x128xf32>,
    %c0_54 = arith.constant 0 : index
    %c0_55 = arith.constant 0 : index
    %77 = vector.load %arg11[%c0_54, %c0_55] : memref<32x128xf32, #tpu.memory_space<vmem>>, vector<32x128xf32>
    %cst_56 = arith.constant dense<0.000000e+00> : vector<128xf32>
    %78 = vector.multi_reduction <add>, %77, %cst_56 [0] : vector<32x128xf32> to vector<128xf32>
    %79 = vector.shape_cast %78 : vector<128xf32> to vector<1x128xf32>
    %cst_57 = arith.constant dense<0.000000e+00> : vector<1x128xf32>
    %80 = tpu.matmul %79, %36, %cst_57 {dimension_numbers = #tpu.dot_dimension_numbers<[1], [0], [0], [1], [0, 0, 1, 1], [], []>} : vector<1x128xf32>, vector<128x128xf32>, vector<1x128xf32> -> vector<1x128xf32>
    %cst_58 = arith.constant 5.120000e+02 : f32
    %81 = vector.broadcast %cst_58 : f32 to vector<1x128xf32>
    %82 = arith.divf %80, %81 : vector<1x128xf32>
    %83 = vector.broadcast %82 : vector<1x128xf32> to vector<32x128xf32>
    %84 = arith.subf %77, %83 : vector<32x128xf32>
    %85 = arith.mulf %84, %84 : vector<32x128xf32>
    %cst_59 = arith.constant dense<0.000000e+00> : vector<128xf32>
    %86 = vector.multi_reduction <add>, %85, %cst_59 [0] : vector<32x128xf32> to vector<128xf32>
    %87 = vector.shape_cast %86 : vector<128xf32> to vector<1x128xf32>
    %cst_60 = arith.constant dense<0.000000e+00> : vector<1x128xf32>
    %88 = tpu.matmul %87, %36, %cst_60 {dimension_numbers = #tpu.dot_dimension_numbers<[1], [0], [0], [1], [0, 0, 1, 1], [], []>} : vector<1x128xf32>, vector<128x128xf32>, vector<1x128xf32> -> vector<1x128xf32>
    %cst_61 = arith.constant 5.120000e+02 : f32
    %89 = vector.broadcast %cst_61 : f32 to vector<1x128xf32>
    %90 = arith.divf %88, %89 : vector<1x128xf32>
    %c0_62 = arith.constant 0 : index
    %c0_63 = arith.constant 0 : index
    %91 = vector.load %arg4[%c0_62, %c0_63] : memref<1x128xf32, #tpu.memory_space<vmem>>, vector<1x128xf32>
    %cst_64 = arith.constant 9.99999974E-6 : f32
    %92 = vector.broadcast %cst_64 : f32 to vector<1x128xf32>
    %93 = arith.addf %90, %92 : vector<1x128xf32>
    %94 = math.rsqrt %93 : vector<1x128xf32>
    %95 = arith.mulf %91, %94 : vector<1x128xf32>
    %c0_65 = arith.constant 0 : index
    %c0_66 = arith.constant 0 : index
    %96 = vector.load %arg5[%c0_65, %c0_66] : memref<1x128xf32, #tpu.memory_space<vmem>>, vector<1x128xf32>
    %97 = arith.mulf %82, %95 : vector<1x128xf32>
    %98 = arith.subf %96, %97 : vector<1x128xf32>
    %cst_67 = arith.constant 0.000000e+00 : f32
    %99 = vector.broadcast %cst_67 : f32 to vector<36x128xf32>
    %c0_68 = arith.constant 0 : index
    %c0_69 = arith.constant 0 : index
    %100 = vector.load %arg10[%c0_68, %c0_69] : memref<36x128xf32, #tpu.memory_space<vmem>>, vector<36x128xf32>
    tpu.vector_store %arg10[%c0_68, %c0_69], %99 {strides = array<i32>} : memref<36x128xf32, #tpu.memory_space<vmem>>, vector<36x128xf32>,
    %101 = vector.extract_strided_slice %77 {offsets = [0, 0], sizes = [16, 128], strides = [1, 1]} : vector<32x128xf32> to vector<16x128xf32>
    %102 = vector.broadcast %95 : vector<1x128xf32> to vector<16x128xf32>
    %103 = arith.mulf %101, %102 : vector<16x128xf32>
    %104 = vector.broadcast %98 : vector<1x128xf32> to vector<16x128xf32>
    %105 = arith.addf %103, %104 : vector<16x128xf32>
    %cst_70 = arith.constant 0.000000e+00 : f32
    %106 = vector.broadcast %cst_70 : f32 to vector<16x128xf32>
    %107 = arith.maximumf %105, %106 : vector<16x128xf32>
    %c1_71 = arith.constant 1 : index
    %c0_72 = arith.constant 0 : index
    %108 = vector.load %arg10[%c1_71, %c0_72] : memref<36x128xf32, #tpu.memory_space<vmem>>, vector<16x128xf32>
    tpu.vector_store %arg10[%c1_71, %c0_72], %107 {strides = array<i32>} : memref<36x128xf32, #tpu.memory_space<vmem>>, vector<16x128xf32>,
    %109 = vector.extract_strided_slice %77 {offsets = [16, 0], sizes = [16, 128], strides = [1, 1]} : vector<32x128xf32> to vector<16x128xf32>
    %110 = vector.broadcast %95 : vector<1x128xf32> to vector<16x128xf32>
    %111 = arith.mulf %109, %110 : vector<16x128xf32>
    %112 = vector.broadcast %98 : vector<1x128xf32> to vector<16x128xf32>
    %113 = arith.addf %111, %112 : vector<16x128xf32>
    %cst_73 = arith.constant 0.000000e+00 : f32
    %114 = vector.broadcast %cst_73 : f32 to vector<16x128xf32>
    %115 = arith.maximumf %113, %114 : vector<16x128xf32>
    %c19_74 = arith.constant 19 : index
    %c0_75 = arith.constant 0 : index
    %116 = vector.load %arg10[%c19_74, %c0_75] : memref<36x128xf32, #tpu.memory_space<vmem>>, vector<16x128xf32>
    tpu.vector_store %arg10[%c19_74, %c0_75], %115 {strides = array<i32>} : memref<36x128xf32, #tpu.memory_space<vmem>>, vector<16x128xf32>,
    %cst_76 = arith.constant 0.000000e+00 : f32
    %117 = vector.broadcast %cst_76 : f32 to vector<16x128xf32>
    %c0_77 = arith.constant 0 : index
    %c0_78 = arith.constant 0 : index
    %118 = vector.load %arg10[%c0_77, %c0_78] : memref<36x128xf32, #tpu.memory_space<vmem>>, vector<16x128xf32>
    %c0_79 = arith.constant 0 : index
    %c0_80 = arith.constant 0 : index
    %c0_81 = arith.constant 0 : index
    %119 = vector.load %arg3[%c0_79, %c0_80, %c0_81] : memref<3x128x128xf32, #tpu.memory_space<vmem>>, vector<1x128x128xf32>
    %120 = vector.shape_cast %119 : vector<1x128x128xf32> to vector<128x128xf32>
    %cst_82 = arith.constant dense<0.000000e+00> : vector<16x128xf32>
    %121 = tpu.matmul %118, %120, %cst_82 {dimension_numbers = #tpu.dot_dimension_numbers<[1], [0], [0], [1], [0, 0, 1, 1], [], []>} : vector<16x128xf32>, vector<128x128xf32>, vector<16x128xf32> -> vector<16x128xf32>
    %122 = arith.addf %117, %121 : vector<16x128xf32>
    %c1_83 = arith.constant 1 : index
    %c0_84 = arith.constant 0 : index
    %123 = vector.load %arg10[%c1_83, %c0_84] : memref<36x128xf32, #tpu.memory_space<vmem>>, vector<16x128xf32>
    %c1_85 = arith.constant 1 : index
    %c0_86 = arith.constant 0 : index
    %c0_87 = arith.constant 0 : index
    %124 = vector.load %arg3[%c1_85, %c0_86, %c0_87] : memref<3x128x128xf32, #tpu.memory_space<vmem>>, vector<1x128x128xf32>
    %125 = vector.shape_cast %124 : vector<1x128x128xf32> to vector<128x128xf32>
    %cst_88 = arith.constant dense<0.000000e+00> : vector<16x128xf32>
    %126 = tpu.matmul %123, %125, %cst_88 {dimension_numbers = #tpu.dot_dimension_numbers<[1], [0], [0], [1], [0, 0, 1, 1], [], []>} : vector<16x128xf32>, vector<128x128xf32>, vector<16x128xf32> -> vector<16x128xf32>
    %127 = arith.addf %122, %126 : vector<16x128xf32>
    %c2_89 = arith.constant 2 : index
    %c0_90 = arith.constant 0 : index
    %128 = vector.load %arg10[%c2_89, %c0_90] : memref<36x128xf32, #tpu.memory_space<vmem>>, vector<16x128xf32>
    %c2_91 = arith.constant 2 : index
    %c0_92 = arith.constant 0 : index
    %c0_93 = arith.constant 0 : index
    %129 = vector.load %arg3[%c2_91, %c0_92, %c0_93] : memref<3x128x128xf32, #tpu.memory_space<vmem>>, vector<1x128x128xf32>
    %130 = vector.shape_cast %129 : vector<1x128x128xf32> to vector<128x128xf32>
    %cst_94 = arith.constant dense<0.000000e+00> : vector<16x128xf32>
    %131 = tpu.matmul %128, %130, %cst_94 {dimension_numbers = #tpu.dot_dimension_numbers<[1], [0], [0], [1], [0, 0, 1, 1], [], []>} : vector<16x128xf32>, vector<128x128xf32>, vector<16x128xf32> -> vector<16x128xf32>
    %132 = arith.addf %127, %131 : vector<16x128xf32>
    %c0_95 = arith.constant 0 : index
    %c0_96 = arith.constant 0 : index
    %133 = vector.load %arg11[%c0_95, %c0_96] : memref<32x128xf32, #tpu.memory_space<vmem>>, vector<16x128xf32>
    tpu.vector_store %arg11[%c0_95, %c0_96], %132 {strides = array<i32>} : memref<32x128xf32, #tpu.memory_space<vmem>>, vector<16x128xf32>,
    %cst_97 = arith.constant 0.000000e+00 : f32
    %134 = vector.broadcast %cst_97 : f32 to vector<16x128xf32>
    %c18_98 = arith.constant 18 : index
    %c0_99 = arith.constant 0 : index
    %135 = vector.load %arg10[%c18_98, %c0_99] : memref<36x128xf32, #tpu.memory_space<vmem>>, vector<16x128xf32>
    %c0_100 = arith.constant 0 : index
    %c0_101 = arith.constant 0 : index
    %c0_102 = arith.constant 0 : index
    %136 = vector.load %arg3[%c0_100, %c0_101, %c0_102] : memref<3x128x128xf32, #tpu.memory_space<vmem>>, vector<1x128x128xf32>
    %137 = vector.shape_cast %136 : vector<1x128x128xf32> to vector<128x128xf32>
    %cst_103 = arith.constant dense<0.000000e+00> : vector<16x128xf32>
    %138 = tpu.matmul %135, %137, %cst_103 {dimension_numbers = #tpu.dot_dimension_numbers<[1], [0], [0], [1], [0, 0, 1, 1], [], []>} : vector<16x128xf32>, vector<128x128xf32>, vector<16x128xf32> -> vector<16x128xf32>
    %139 = arith.addf %134, %138 : vector<16x128xf32>
    %c19_104 = arith.constant 19 : index
    %c0_105 = arith.constant 0 : index
    %140 = vector.load %arg10[%c19_104, %c0_105] : memref<36x128xf32, #tpu.memory_space<vmem>>, vector<16x128xf32>
    %c1_106 = arith.constant 1 : index
    %c0_107 = arith.constant 0 : index
    %c0_108 = arith.constant 0 : index
    %141 = vector.load %arg3[%c1_106, %c0_107, %c0_108] : memref<3x128x128xf32, #tpu.memory_space<vmem>>, vector<1x128x128xf32>
    %142 = vector.shape_cast %141 : vector<1x128x128xf32> to vector<128x128xf32>
    %cst_109 = arith.constant dense<0.000000e+00> : vector<16x128xf32>
    %143 = tpu.matmul %140, %142, %cst_109 {dimension_numbers = #tpu.dot_dimension_numbers<[1], [0], [0], [1], [0, 0, 1, 1], [], []>} : vector<16x128xf32>, vector<128x128xf32>, vector<16x128xf32> -> vector<16x128xf32>
    %144 = arith.addf %139, %143 : vector<16x128xf32>
    %c20_110 = arith.constant 20 : index
    %c0_111 = arith.constant 0 : index
    %145 = vector.load %arg10[%c20_110, %c0_111] : memref<36x128xf32, #tpu.memory_space<vmem>>, vector<16x128xf32>
    %c2_112 = arith.constant 2 : index
    %c0_113 = arith.constant 0 : index
    %c0_114 = arith.constant 0 : index
    %146 = vector.load %arg3[%c2_112, %c0_113, %c0_114] : memref<3x128x128xf32, #tpu.memory_space<vmem>>, vector<1x128x128xf32>
    %147 = vector.shape_cast %146 : vector<1x128x128xf32> to vector<128x128xf32>
    %cst_115 = arith.constant dense<0.000000e+00> : vector<16x128xf32>
    %148 = tpu.matmul %145, %147, %cst_115 {dimension_numbers = #tpu.dot_dimension_numbers<[1], [0], [0], [1], [0, 0, 1, 1], [], []>} : vector<16x128xf32>, vector<128x128xf32>, vector<16x128xf32> -> vector<16x128xf32>
    %149 = arith.addf %144, %148 : vector<16x128xf32>
    %c16_116 = arith.constant 16 : index
    %c0_117 = arith.constant 0 : index
    %150 = vector.load %arg11[%c16_116, %c0_117] : memref<32x128xf32, #tpu.memory_space<vmem>>, vector<16x128xf32>
    tpu.vector_store %arg11[%c16_116, %c0_117], %149 {strides = array<i32>} : memref<32x128xf32, #tpu.memory_space<vmem>>, vector<16x128xf32>,
    %c0_118 = arith.constant 0 : index
    %c0_119 = arith.constant 0 : index
    %151 = vector.load %arg11[%c0_118, %c0_119] : memref<32x128xf32, #tpu.memory_space<vmem>>, vector<32x128xf32>
    %cst_120 = arith.constant dense<0.000000e+00> : vector<128xf32>
    %152 = vector.multi_reduction <add>, %151, %cst_120 [0] : vector<32x128xf32> to vector<128xf32>
    %153 = vector.shape_cast %152 : vector<128xf32> to vector<1x128xf32>
    %cst_121 = arith.constant dense<0.000000e+00> : vector<1x128xf32>
    %154 = tpu.matmul %153, %36, %cst_121 {dimension_numbers = #tpu.dot_dimension_numbers<[1], [0], [0], [1], [0, 0, 1, 1], [], []>} : vector<1x128xf32>, vector<128x128xf32>, vector<1x128xf32> -> vector<1x128xf32>
    %cst_122 = arith.constant 5.120000e+02 : f32
    %155 = vector.broadcast %cst_122 : f32 to vector<1x128xf32>
    %156 = arith.divf %154, %155 : vector<1x128xf32>
    %157 = vector.broadcast %156 : vector<1x128xf32> to vector<32x128xf32>
    %158 = arith.subf %151, %157 : vector<32x128xf32>
    %159 = arith.mulf %158, %158 : vector<32x128xf32>
    %cst_123 = arith.constant dense<0.000000e+00> : vector<128xf32>
    %160 = vector.multi_reduction <add>, %159, %cst_123 [0] : vector<32x128xf32> to vector<128xf32>
    %161 = vector.shape_cast %160 : vector<128xf32> to vector<1x128xf32>
    %cst_124 = arith.constant dense<0.000000e+00> : vector<1x128xf32>
    %162 = tpu.matmul %161, %36, %cst_124 {dimension_numbers = #tpu.dot_dimension_numbers<[1], [0], [0], [1], [0, 0, 1, 1], [], []>} : vector<1x128xf32>, vector<128x128xf32>, vector<1x128xf32> -> vector<1x128xf32>
    %cst_125 = arith.constant 5.120000e+02 : f32
    %163 = vector.broadcast %cst_125 : f32 to vector<1x128xf32>
    %164 = arith.divf %162, %163 : vector<1x128xf32>
    %c0_126 = arith.constant 0 : index
    %c0_127 = arith.constant 0 : index
    %165 = vector.load %arg6[%c0_126, %c0_127] : memref<1x128xf32, #tpu.memory_space<vmem>>, vector<1x128xf32>
    %cst_128 = arith.constant 9.99999974E-6 : f32
    %166 = vector.broadcast %cst_128 : f32 to vector<1x128xf32>
    %167 = arith.addf %164, %166 : vector<1x128xf32>
    %168 = math.rsqrt %167 : vector<1x128xf32>
    %169 = arith.mulf %165, %168 : vector<1x128xf32>
    %c0_129 = arith.constant 0 : index
    %c0_130 = arith.constant 0 : index
    %170 = vector.load %arg7[%c0_129, %c0_130] : memref<1x128xf32, #tpu.memory_space<vmem>>, vector<1x128xf32>
    %171 = arith.mulf %156, %169 : vector<1x128xf32>
    %172 = arith.subf %170, %171 : vector<1x128xf32>
    %173 = vector.broadcast %169 : vector<1x128xf32> to vector<32x128xf32>
    %174 = arith.mulf %151, %173 : vector<32x128xf32>
    %175 = vector.broadcast %172 : vector<1x128xf32> to vector<32x128xf32>
    %176 = arith.addf %174, %175 : vector<32x128xf32>
    %cst_131 = arith.constant 0.000000e+00 : f32
    %177 = vector.broadcast %cst_131 : f32 to vector<32x128xf32>
    %178 = arith.maximumf %176, %177 : vector<32x128xf32>
    %c0_132 = arith.constant 0 : index
    %c0_133 = arith.constant 0 : index
    %179 = vector.load %arg8[%c0_132, %c0_133] : memref<32x128xf32, #tpu.memory_space<vmem>>, vector<32x128xf32>
    tpu.vector_store %arg8[%c0_132, %c0_133], %178 {strides = array<i32>} : memref<32x128xf32, #tpu.memory_space<vmem>>, vector<32x128xf32>,
    return
  }
  func.func @transform_0(%arg0: i32) -> (i32, i32) {
    %c0_i32 = arith.constant 0 : i32
    %c0_i32_0 = arith.constant 0 : i32
    %c0_i32_1 = arith.constant 0 : i32
    return %c0_i32, %c0_i32_0 : i32, i32
  }
  func.func @transform_1(%arg0: i32) -> (i32, i32, i32) {
    %c0_i32 = arith.constant 0 : i32
    %c0_i32_0 = arith.constant 0 : i32
    %c0_i32_1 = arith.constant 0 : i32
    %c0_i32_2 = arith.constant 0 : i32
    return %c0_i32, %c0_i32_0, %c0_i32_1 : i32, i32, i32
  }
  func.func @transform_2(%arg0: i32) -> (i32, i32, i32) {
    %c0_i32 = arith.constant 0 : i32
    %c0_i32_0 = arith.constant 0 : i32
    %c0_i32_1 = arith.constant 0 : i32
    %c0_i32_2 = arith.constant 0 : i32
    return %c0_i32, %c0_i32_0, %c0_i32_1 : i32, i32, i32
  }
  func.func @transform_3(%arg0: i32) -> (i32, i32) {
    %c0_i32 = arith.constant 0 : i32
    %c0_i32_0 = arith.constant 0 : i32
    %c0_i32_1 = arith.constant 0 : i32
    return %c0_i32, %c0_i32_0 : i32, i32
  }
  func.func @transform_4(%arg0: i32) -> (i32, i32) {
    %c0_i32 = arith.constant 0 : i32
    %c0_i32_0 = arith.constant 0 : i32
    %c0_i32_1 = arith.constant 0 : i32
    return %c0_i32, %c0_i32_0 : i32, i32
  }
  func.func @transform_5(%arg0: i32) -> (i32, i32) {
    %c0_i32 = arith.constant 0 : i32
    %c0_i32_0 = arith.constant 0 : i32
    %c0_i32_1 = arith.constant 0 : i32
    return %c0_i32, %c0_i32_0 : i32, i32
  }
  func.func @transform_6(%arg0: i32) -> (i32, i32) {
    %c0_i32 = arith.constant 0 : i32
    %c0_i32_0 = arith.constant 0 : i32
    %c0_i32_1 = arith.constant 0 : i32
    return %c0_i32, %c0_i32_0 : i32, i32
  }
  func.func @transform_7(%arg0: i32) -> (i32, i32) {
    %c0_i32 = arith.constant 0 : i32
    %c0_i32_0 = arith.constant 0 : i32
    %c0_i32_1 = arith.constant 0 : i32
    return %c0_i32, %c0_i32_0 : i32, i32
  }
}

</mosaic_0001>

<bundles_post_ra>
// kernel: tile.23
= control target key start
LH: loop header
LB: loop body
LE: loop exit
PB: predicated region body
PF: predicated region fallthrough
CT: control target
= control target key end

     0   :  { %s28_s0 = inlined_call_operand.vmem [shape: f32[8], index: 0, kind: input, shape index: {}]   ;;  %s29_s1 = inlined_call_operand.vmem [shape: f32[16,8], index: 1, kind: output, shape index: {}]  }
   0x1   :  { %v4_v0 = vld [vmem:[%s28_s0] ss:$0 sm:$0xff] }
   0x2   :  { %5 = vst [vmem:[%s29_s1] sm:$0xff] %v4_v0  ;;  %8 = vst [vmem:[%s29_s1 + $0x8] sm:$0xff] %v4_v0 }

// kernel: tile.24
= control target key start
LH: loop header
LB: loop body
LE: loop exit
PB: predicated region body
PF: predicated region fallthrough
CT: control target
= control target key end

     0   :  { %s131_s10 = smov 120   ;;  %s132_s11 = smov 104   ;;  %vm3_vm0 = vcmask 64512   ;;  %vm9_vm1 = vcmask 1048512   ;;  %vm15_vm2 = vcmask 982912   ;;  %vm21_vm3 = vcmask 917312   ;;  %s207_s0 = inlined_call_operand.vmem [shape: f32[16,8], index: 0, kind: input, shape index: {}]   ;;  %s208_s1 = inlined_call_operand.vmem [shape: f32[1,128], index: 1, kind: output, shape index: {}]  }
   0x1   :  { %v101_v0 = vld [vmem:[%s207_s0 + $0xf] sm:$0x1]   ;;  %v103_v1 = vld [vmem:[%s207_s0 + $0xd] sm:$0x1]   ;;  %v102_v2 = vld [vmem:[%s207_s0 + $0xe] sm:$0x1]  }
   0x2   :  { %7 = vrot.lane.b32.xlu0 %v101_v0, %s131_s10  ;;  %19 = vrot.lane.b32.xlu1 %v103_v1, %s132_s11  ;;  %v104_v3 = vld [vmem:[%s207_s0 + $0xc] sm:$0x1]   ;;  %s133_s16 = smov 112   ;;  %s134_s17 = smov 96   ;;  %v105_v4 = vld [vmem:[%s207_s0 + $0xb] sm:$0x1]  }
   0x3   :  { %v106_v5 = vld [vmem:[%s207_s0 + $0xa] sm:$0x1]   ;;  %v2_v6 = vld [vmem:[%s207_s0] sm:$0x1]   ;;  %s135_s24 = smov 88   ;;  %s136_s25 = smov 80  }
   0x4   :  { %4 = vst.msk [vmem:[#allocation0] sm:$0x1] %vm3_vm0, %v2_v6   ;;  %v107_v7 = vld [vmem:[%s207_s0 + $0x9] sm:$0x1]   ;;  %v108_v8 = vld [vmem:[%s207_s0 + $0x8] sm:$0x1]  }
   0x5   :  { %s137_s30 = smov 72   ;;  %s138_s2 = smov 64   ;;  %v109_v9 = vld [vmem:[%s207_s0 + $0x7] sm:$0x1]   ;;  %v110_v10 = vld [vmem:[%s207_s0 + $0x6] sm:$0x1]  }
   0x6   :  { %13 = vrot.lane.b32.xlu0 %v102_v2, %s133_s16  ;;  %25 = vrot.lane.b32.xlu1 %v104_v3, %s134_s17  ;;  %s139_s7 = smov 56   ;;  %s140_s8 = smov 48   ;;  %v111_v11 = vld [vmem:[%s207_s0 + $0x5] sm:$0x1]   ;;  %v112_v12 = vld [vmem:[%s207_s0 + $0x4] sm:$0x1]  }
   0x7   :  { %s141_s13 = smov 40   ;;  %s142_s14 = smov 32   ;;  %v113_v13 = vld [vmem:[%s207_s0 + $0x3] sm:$0x1]   ;;  %v114_v14 = vld [vmem:[%s207_s0 + $0x2] sm:$0x1]  }
   0x8   :  { %s143_s19 = smov 24   ;;  %s144_s20 = smov 16   ;;  %v115_v15 = vld [vmem:[%s207_s0 + $0x1] sm:$0x1]   ;;  %vm27_vm4 = vcmask 851712   ;;  %vm33_vm5 = vcmask 786112  }
   0x9   :  { %s145_s0 = smov 8   ;;  %vm39_vm6 = vcmask 720512   ;;  %vm45_vm7 = vcmask 654912   ;;  %vm51_vm8 = vcmask 589312   ;;  %vm57_vm9 = vcmask 523712  }
   0xa   :  { %31 = vrot.lane.b32.xlu0 %v105_v4, %s135_s24  ;;  %37 = vrot.lane.b32.xlu1 %v106_v5, %s136_s25  ;;  %vm63_vm10 = vcmask 458112   ;;  %vm69_vm11 = vcmask 392512   ;;  %vm75_vm12 = vcmask 326912   ;;  %vm81_vm13 = vcmask 261312  }
   0xb   :  { %vm87_vm14 = vcmask 195712   ;;  %vm93_vm15 = vcmask 130112  }
   0xe   :  { %43 = vrot.lane.b32.xlu0 %v107_v7, %s137_s30  ;;  %49 = vrot.lane.b32.xlu1 %v108_v8, %s138_s2 }
  0x12   :  { %55 = vrot.lane.b32.xlu0 %v109_v9, %s139_s7  ;;  %61 = vrot.lane.b32.xlu1 %v110_v10, %s140_s8 }
  0x16   :  { %67 = vrot.lane.b32.xlu0 %v111_v11, %s141_s13  ;;  %73 = vrot.lane.b32.xlu1 %v112_v12, %s142_s14 }
  0x1a   :  { %79 = vrot.lane.b32.xlu0 %v113_v13, %s143_s19  ;;  %85 = vrot.lane.b32.xlu1 %v114_v14, %s144_s20 }
  0x1e   :  { %91 = vrot.lane.b32.xlu0 %v115_v15, %s145_s0 }
  0x74   :  { %v8_v16 = vpop.permute.xlu0 %7   ;;  %v20_v17 = vpop.permute.xlu1 %19  }
  0x75   :  { %10 = vst.msk [vmem:[#allocation0] sm:$0x1] %vm9_vm1, %v8_v16  }
  0x78   :  { %v14_v18 = vpop.permute.xlu0 %13   ;;  %v26_v19 = vpop.permute.xlu1 %25  }
  0x79   :  { %16 = vst.msk [vmem:[#allocation0] sm:$0x1] %vm15_vm2, %v14_v18  }
  0x7a   :  { %22 = vst.msk [vmem:[#allocation0] sm:$0x1] %vm21_vm3, %v20_v17  }
  0x7b   :  { %28 = vst.msk [vmem:[#allocation0] sm:$0x1] %vm27_vm4, %v26_v19  }
  0x7c   :  { %v32_v20 = vpop.permute.xlu0 %31   ;;  %v38_v21 = vpop.permute.xlu1 %37  }
  0x7d   :  { %34 = vst.msk [vmem:[#allocation0] sm:$0x1] %vm33_vm5, %v32_v20  }
  0x7e   :  { %40 = vst.msk [vmem:[#allocation0] sm:$0x1] %vm39_vm6, %v38_v21  }
  0x80   :  { %v44_v22 = vpop.permute.xlu0 %43   ;;  %v50_v23 = vpop.permute.xlu1 %49  }
  0x81   :  { %46 = vst.msk [vmem:[#allocation0] sm:$0x1] %vm45_vm7, %v44_v22  }
  0x82   :  { %52 = vst.msk [vmem:[#allocation0] sm:$0x1] %vm51_vm8, %v50_v23  }
  0x84   :  { %v56_v24 = vpop.permute.xlu0 %55   ;;  %v62_v25 = vpop.permute.xlu1 %61  }
  0x85   :  { %58 = vst.msk [vmem:[#allocation0] sm:$0x1] %vm57_vm9, %v56_v24  }
  0x86   :  { %64 = vst.msk [vmem:[#allocation0] sm:$0x1] %vm63_vm10, %v62_v25  }
  0x88   :  { %v68_v26 = vpop.permute.xlu0 %67   ;;  %v74_v27 = vpop.permute.xlu1 %73  }
  0x89   :  { %70 = vst.msk [vmem:[#allocation0] sm:$0x1] %vm69_vm11, %v68_v26  }
  0x8a   :  { %76 = vst.msk [vmem:[#allocation0] sm:$0x1] %vm75_vm12, %v74_v27  }
  0x8c   :  { %v80_v28 = vpop.permute.xlu0 %79   ;;  %v86_v29 = vpop.permute.xlu1 %85  }
  0x8d   :  { %82 = vst.msk [vmem:[#allocation0] sm:$0x1] %vm81_vm13, %v80_v28  }
  0x8e   :  { %88 = vst.msk [vmem:[#allocation0] sm:$0x1] %vm87_vm14, %v86_v29  }
  0x90   :  { %v92_v30 = vpop.permute.xlu0 %91  }
  0x91   :  { %94 = vst.msk [vmem:[#allocation0] sm:$0x1] %vm93_vm15, %v92_v30  }
  0x98   :  { %v98_v31 = vld [vmem:[#allocation0] sm:$0x1] }
  0x99   :  { %100 = vst [vmem:[%s208_s1] sm:$0x1] %v98_v31 }

// kernel: block_forward.1
= control target key start
LH: loop header
LB: loop body
LE: loop exit
PB: predicated region body
PF: predicated region fallthrough
CT: control target
= control target key end

     0   :  { %vm297_vm0 = vcmask 523264   ;;  %vm302_vm1 = vcmask 519168   ;;  %v3164_v3 = vmov 0.0   ;;  %v26_v40 = vlaneseq  ;;  %s3727_s1 = inlined_call_operand.vmem [shape: f32[3,64,128], index: 1, kind: input, shape index: {}]   ;;  %s3728_s0 = inlined_call_operand.vmem [shape: f32[32,64], index: 0, kind: input, shape index: {}]   ;;  %s3729_s2 = inlined_call_operand.vmem [shape: f32[3,128,128], index: 2, kind: input, shape index: {}]   ;;  %s3730_s3 = inlined_call_operand.vmem [shape: f32[1,128], index: 3, kind: input, shape index: {}]   ;;  %s3731_s4 = inlined_call_operand.vmem [shape: f32[1,128], index: 4, kind: input, shape index: {}]   ;;  %s3732_s5 = inlined_call_operand.vmem [shape: f32[1,128], index: 5, kind: input, shape index: {}]   ;;  %s3733_s6 = inlined_call_operand.vmem [shape: f32[1,128], index: 6, kind: input, shape index: {}]   ;;  %s3734_s7 = inlined_call_operand.vmem [shape: f32[32,128], index: 7, kind: output, shape index: {}]  }
   0x1   :  { %v1884_v0 = vld [vmem:[%s3727_s1 + $0x40] sm:$0xff]  ;;  %v1885_v1 = vld [vmem:[%s3727_s1 + $0x48] sm:$0xff]  ;;  %v1886_v2 = vld [vmem:[%s3727_s1 + $0x50] sm:$0xff]  ;;  %298 = vst.msk [vmem:[#allocation2] sm:$0xff] %vm297_vm0, %v3164_v3 }
   0x2   :  { %299 = vst.msk [vmem:[#allocation2 + $0x8] sm:$0xff] %vm297_vm0, %v3164_v3  ;;  %300 = vst.msk [vmem:[#allocation2 + $0x10] sm:$0xff] %vm297_vm0, %v3164_v3  ;;  %v2756_v4 = vpack.c.bf16 %v1885_v1, %v1884_v0  ;;  %v1887_v5 = vld [vmem:[%s3727_s1 + $0x58] sm:$0xff]  ;;  %v1888_v7 = vld [vmem:[%s3727_s1 + $0x60] sm:$0xff]  ;;  %v3310_v46 = vshrl.u32 %v26_v40, 7  ;;  %v44_v50 = vand.u32 127, %v26_v40 }
   0x3   :  { %301 = vst.msk [vmem:[#allocation2 + $0x18] sm:$0xff] %vm297_vm0, %v3164_v3  ;;  %1052 = vst [vmem:[#allocation3] sm:$0xff] %v3164_v3  ;;  %v2760_v6 = vpack.c.bf16 %v1887_v5, %v1886_v2  ;;  %v1889_v8 = vld [vmem:[%s3727_s1 + $0x68] sm:$0xff]  ;;  %v304_v9 = vld [vmem:[%s3728_s0] sm:$0xff]  ;;  %v3165_v2 = vmov 0.0|0.0  }
   0x4   :  { %1053 = vst [vmem:[#allocation3 + $0x8] sm:$0xff] %v3164_v3  ;;  %1054 = vst [vmem:[#allocation3 + $0x10] sm:$0xff] %v3164_v3  ;;  %2757 = vmatprep.subr.bf16.mxu0 %v2756_v4  ;;  %2805 = vmatprep.subr.bf16.mxu1 %v2756_v4  ;;  %v308_v10 = vld [vmem:[%s3728_s0 + $0x10] sm:$0xff]  ;;  %v305_v11 = vld [vmem:[%s3728_s0 + $0x8] sm:$0xff]  ;;  %v2764_v13 = vpack.c.bf16 %v1889_v8, %v1888_v7  ;;  %v28_v53 = vadd.s32 8, %v3310_v46  ;;  %v49_v55 = vand.u32 7, %v3310_v46 }
   0x5   :  { %1055 = vst [vmem:[#allocation3 + $0x18] sm:$0xff] %v3164_v3  ;;  %1056 = vst [vmem:[#allocation3 + $0x20] sm:$0xf] %v3164_v3  ;;  %2759 = vmatpush3.bf16.msra.mxu0 %v2756_v4  ;;  %2807 = vmatpush3.bf16.msra.mxu1 %v2756_v4  ;;  %v309_v12 = vld [vmem:[%s3728_s0 + $0x18] sm:$0xff]  ;;  %v1890_v14 = vld [vmem:[%s3727_s1 + $0x70] sm:$0xff]  ;;  %v3324_v56 = vand.u32 7, %v44_v50 }
   0x6   :  { %303 = vst.msk [vmem:[#allocation2 + $0x20] sm:$0xf] %vm302_vm1, %v3164_v3  ;;  %2761 = vmatprep.subr.bf16.mxu0 %v2760_v6  ;;  %2809 = vmatprep.subr.bf16.mxu1 %v2760_v6  ;;  %v1891_v15 = vld [vmem:[%s3727_s1 + $0x78] sm:$0xff]  ;;  %v314_v18 = vld [vmem:[%s3727_s1] sm:$0xff]  ;;  %v315_v19 = vld [vmem:[%s3727_s1 + $0x8] sm:$0xff]  ;;  %v56_v57 = vand.u32 7, %v28_v53 }
   0x7   :  { %306 = vst.msk [vmem:[#allocation2 + $0x1] sm:$0xff] %vm297_vm0, %v304_v9  ;;  %310 = vst.msk [vmem:[#allocation2 + $0x13] sm:$0xff] %vm297_vm0, %v308_v10  ;;  %v2768_v16 = vpack.c.bf16 %v1891_v15, %v1890_v14  ;;  %v2772_v21 = vpack.c.bf16 %v315_v19, %v314_v18  ;;  %v316_v22 = vld [vmem:[%s3727_s1 + $0x10] sm:$0xff]  ;;  %v317_v23 = vld [vmem:[%s3727_s1 + $0x18] sm:$0xff]  ;;  %v29_v58 = vadd.s32 16, %v3310_v46  ;;  %v30_v59 = vadd.s32 24, %v3310_v46 }
   0x8   :  { %307 = vst.msk [vmem:[#allocation2 + $0x9] sm:$0xff] %vm297_vm0, %v305_v11  ;;  %311 = vst.msk [vmem:[#allocation2 + $0x1b] sm:$0xff] %vm297_vm0, %v309_v12  ;;  %v2776_v26 = vpack.c.bf16 %v317_v23, %v316_v22  ;;  %v318_v27 = vld [vmem:[%s3727_s1 + $0x20] sm:$0xff]  ;;  %v319_v28 = vld [vmem:[%s3727_s1 + $0x28] sm:$0xff]  ;;  %vm249_vm2 = vcmp.eq.s32.totalorder %v49_v55, %v3324_v56  ;;  %v31_v60 = vadd.s32 32, %v3310_v46  ;;  %vm250_vm3 = vcmp.eq.s32.totalorder %v56_v57, %v3324_v56 }
   0x9   :  { %2763 = vmatpush3.bf16.msra.mxu0 %v2760_v6  ;;  %2811 = vmatpush3.bf16.msra.mxu1 %v2760_v6  ;;  %v2780_v31 = vpack.c.bf16 %v319_v28, %v318_v27  ;;  %v320_v32 = vld [vmem:[%s3727_s1 + $0x30] sm:$0xff]  ;;  %v321_v33 = vld [vmem:[%s3727_s1 + $0x38] sm:$0xff]  ;;  %v1896_v35 = vld [vmem:[%s3727_s1 + $0x80] sm:$0xff]  ;;  %v63_v61 = vand.u32 7, %v29_v58  ;;  %v70_v62 = vand.u32 7, %v30_v59  ;;  %v32_v63 = vadd.s32 40, %v3310_v46 }
   0xa   :  { %2765 = vmatprep.subr.bf16.mxu0 %v2764_v13  ;;  %2813 = vmatprep.subr.bf16.mxu1 %v2764_v13  ;;  %v2784_v34 = vpack.c.bf16 %v321_v33, %v320_v32  ;;  %v1897_v36 = vld [vmem:[%s3727_s1 + $0x88] sm:$0xff]  ;;  %v1898_v38 = vld [vmem:[%s3727_s1 + $0x90] sm:$0xff]  ;;  %v1899_v39 = vld [vmem:[%s3727_s1 + $0x98] sm:$0xff]  ;;  %v77_v5 = vand.u32 7, %v31_v60  ;;  %v3166_v7 = vmov 1.0|1.0  }
   0xb   :  { %v2788_v37 = vpack.c.bf16 %v1897_v36, %v1896_v35  ;;  %v2792_v43 = vpack.c.bf16 %v1899_v39, %v1898_v38  ;;  %v1900_v44 = vld [vmem:[%s3727_s1 + $0xa0] sm:$0xff]  ;;  %v1901_v45 = vld [vmem:[%s3727_s1 + $0xa8] sm:$0xff]  ;;  %v1902_v51 = vld [vmem:[%s3727_s1 + $0xb0] sm:$0xff]  ;;  %vm251_vm5 = vcmp.eq.s32.totalorder %v63_v61, %v3324_v56  ;;  %vm252_vm6 = vcmp.eq.s32.totalorder %v70_v62, %v3324_v56 }
   0xc   :  { %v2796_v49 = vpack.c.bf16 %v1901_v45, %v1900_v44  ;;  %v1903_v52 = vld [vmem:[%s3727_s1 + $0xb8] sm:$0xff]  ;;  %vm3333_vm4 = vmpackc.low %vm250_vm3, %vm249_vm2  ;;  %v84_v6 = vand.u32 7, %v32_v63  ;;  %vm253_vm8 = vcmp.eq.s32.totalorder %v77_v5, %v3324_v56  ;;  %v33_v10 = vadd.s32 48, %v3310_v46 }
   0xd   :  { %2767 = vmatpush3.bf16.msra.mxu0 %v2764_v13  ;;  %2815 = vmatpush3.bf16.msra.mxu1 %v2764_v13  ;;  %v2800_v54 = vpack.c.bf16 %v1903_v52, %v1902_v51  ;;  %vm3349_vm7 = vmpackc.low %vm252_vm6, %vm251_vm5  ;;  %v34_v11 = vadd.s32 56, %v3310_v46  ;;  %v35_v14 = vadd.s32 64, %v3310_v46  ;;  %v36_v15 = vadd.s32 72, %v3310_v46 }
   0xe   :  { %v322_v17 = vld [vmem:[#allocation2 + $0x1] sm:$0xff]  ;;  %v601_v20 = vld [vmem:[#allocation2 + $0x13] sm:$0xff]  ;;  %2769 = vmatprep.subr.bf16.mxu0 %v2768_v16  ;;  %2817 = vmatprep.subr.bf16.mxu1 %v2768_v16  ;;  %vm254_vm9 = vcmp.eq.s32.totalorder %v84_v6, %v3324_v56  ;;  %v91_v12 = vand.u32 7, %v33_v10  ;;  %v37_v19 = vadd.s32 80, %v3310_v46 }
   0xf   :  { %2308 = vmatprep.mubr.msk.f32.mxu0 %vm297_vm0, %v322_v17  ;;  %2365 = vmatprep.mubr.msk.f32.mxu1 %vm297_vm0, %v601_v20  ;;  %v323_v24 = vld [vmem:[#allocation2 + $0x9] sm:$0xff]  ;;  %v602_v25 = vld [vmem:[#allocation2 + $0x1b] sm:$0xff]  ;;  %v591_v30 = vld [vmem:[#allocation2 + $0x12] sm:$0xff]  ;;  %v98_v13 = vand.u32 7, %v34_v11  ;;  %v105_v17 = vand.u32 7, %v35_v14  ;;  %v112_v18 = vand.u32 7, %v36_v15 }
  0x10   :  { %v312_v29 = vld [vmem:[#allocation2] sm:$0xff]  ;;  %v313_v41 = vld [vmem:[#allocation2 + $0x8] sm:$0xff]  ;;  %v773_v48 = vld [vmem:[#allocation2 + $0x14] sm:$0xff]  ;;  %vm255_vm11 = vcmp.eq.s32.totalorder %v91_v12, %v3324_v56  ;;  %v38_v20 = vadd.s32 88, %v3310_v46  ;;  %v119_v22 = vand.u32 7, %v37_v19 }
  0x11   :  { %2771 = vmatpush3.bf16.msra.mxu0 %v2768_v16  ;;  %2819 = vmatpush3.bf16.msra.mxu1 %v2768_v16  ;;  %v592_v42 = vld [vmem:[#allocation2 + $0x1a] sm:$0xff]  ;;  %v495_v47 = vld [vmem:[#allocation2 + $0x2] sm:$0xff]  ;;  %v496_v0 = vld [vmem:[#allocation2 + $0xa] sm:$0xff]  ;;  %vm256_vm12 = vcmp.eq.s32.totalorder %v98_v13, %v3324_v56  ;;  %vm257_vm14 = vcmp.eq.s32.totalorder %v105_v17, %v3324_v56  ;;  %vm258_vm15 = vcmp.eq.s32.totalorder %v112_v18, %v3324_v56 }
  0x12   :  { %2773 = vmatprep.subr.bf16.mxu0 %v2772_v21  ;;  %2821 = vmatprep.subr.bf16.mxu1 %v2772_v21  ;;  %v774_v1 = vld [vmem:[#allocation2 + $0x1c] sm:$0xff]  ;;  %vm3363_vm10 = vmpackc.low %vm254_vm9, %vm253_vm8  ;;  %v126_v23 = vand.u32 7, %v38_v20  ;;  %vm259_vm1 = vcmp.eq.s32.totalorder %v119_v22, %v3324_v56  ;;  %vm3167_vm9 = vmmov 0   ;;  %v1961_v13 = vld [vmem:[%s3729_s2 + $0x88] sm:$0xff] }
  0x13   :  { %vm3382_vm13 = vmpackc.low %vm256_vm12, %vm255_vm11  ;;  %v1960_v12 = vld [vmem:[%s3729_s2 + $0x80] sm:$0xff]  ;;  %v1962_v15 = vld [vmem:[%s3729_s2 + $0x90] sm:$0xff] }
  0x14   :  { %2309 = vmatmul.mubr.msk.f32.vlgmr.msra.gmra.mrb[0].mxu0 %vm297_vm0, %v323_v24  ;;  %2366 = vmatmul.mubr.msk.f32.vlgmr.msra.gmra.mrb[0].mxu1 %vm297_vm0, %v602_v25  ;;  %vm260_vm2 = vcmp.eq.s32.totalorder %v126_v23, %v3324_v56  ;;  %v39_v24 = vadd.s32 96, %v3310_v46  ;;  %v40_v25 = vadd.s32 104, %v3310_v46  ;;  %v2900_v14 = vpack.c.bf16 %v1961_v13, %v1960_v12  ;;  %v1963_v17 = vld [vmem:[%s3729_s2 + $0x98] sm:$0xff]  ;;  %v1964_v19 = vld [vmem:[%s3729_s2 + $0xa0] sm:$0xff]  ;;  %v1965_v20 = vld [vmem:[%s3729_s2 + $0xa8] sm:$0xff] }
  0x15   :  { %2775 = vmatpush3.bf16.msra.mxu0 %v2772_v21  ;;  %2823 = vmatpush3.bf16.msra.mxu1 %v2772_v21  ;;  %vm3414_vm3 = vmpackc.low %vm260_vm2, %vm259_vm1  ;;  %v2904_v18 = vpack.c.bf16 %v1963_v17, %v1962_v15  ;;  %v2908_v22 = vpack.c.bf16 %v1965_v20, %v1964_v19  ;;  %v1966_v23 = vld [vmem:[%s3729_s2 + $0xb0] sm:$0xff]  ;;  %v1092_v15 = vld [vmem:[%s3729_s2 + $0x28] sm:$0xff] }
  0x16   :  { %2777 = vmatprep.subr.bf16.mxu0 %v2776_v26  ;;  %2825 = vmatprep.subr.bf16.mxu1 %v2776_v26  ;;  %v133_v27 = vand.u32 7, %v39_v24  ;;  %v140_v28 = vand.u32 7, %v40_v25  ;;  %v1967_v24 = vld [vmem:[%s3729_s2 + $0xb8] sm:$0xff] }
  0x17   :  { %2327 = vmatprep.mubr.msk.f32.mxu0 %vm297_vm0, %v312_v29  ;;  %2384 = vmatprep.mubr.msk.f32.mxu1 %vm297_vm0, %v591_v30  ;;  %v41_v29 = vadd.s32 112, %v3310_v46  ;;  %v42_v30 = vadd.s32 120, %v3310_v46  ;;  %v2912_v25 = vpack.c.bf16 %v1967_v24, %v1966_v23  ;;  %v1094_v19 = vld [vmem:[%s3729_s2 + $0x38] sm:$0xff]  ;;  %v1095_v24 = vld [vmem:[%s3729_s2 + $0x40] sm:$0xff] }
  0x18   :  { %vm261_vm5 = vcmp.eq.s32.totalorder %v133_v27, %v3324_v56  ;;  %vm262_vm6 = vcmp.eq.s32.totalorder %v140_v28, %v3324_v56  ;;  %v1968_v27 = vld [vmem:[%s3729_s2 + $0xc0] sm:$0xff]  ;;  %v1969_v28 = vld [vmem:[%s3729_s2 + $0xc8] sm:$0xff] }
  0x19   :  { %2779 = vmatpush3.bf16.msra.mxu0 %v2776_v26  ;;  %2827 = vmatpush3.bf16.msra.mxu1 %v2776_v26  ;;  %vm3430_vm8 = vmpackc.low %vm262_vm6, %vm261_vm5  ;;  %v147_v32 = vand.u32 7, %v41_v29  ;;  %v154_v33 = vand.u32 7, %v42_v30  ;;  %v2916_v29 = vpack.c.bf16 %v1969_v28, %v1968_v27  ;;  %v1970_v30 = vld [vmem:[%s3729_s2 + $0xd0] sm:$0xff] }
  0x1a   :  { %2781 = vmatprep.subr.bf16.mxu0 %v2780_v31  ;;  %2829 = vmatprep.subr.bf16.mxu1 %v2780_v31  ;;  %v1097_v28 = vld [vmem:[%s3729_s2 + $0x50] sm:$0xff] }
  0x1b   :  { %vm263_vm11 = vcmp.eq.s32.totalorder %v147_v32, %v3324_v56  ;;  %vm264_vm12 = vcmp.eq.s32.totalorder %v154_v33, %v3324_v56  ;;  %v1971_v32 = vld [vmem:[%s3729_s2 + $0xd8] sm:$0xff] }
  0x1c   :  { %v2920_v33 = vpack.c.bf16 %v1971_v32, %v1970_v30  ;;  %v1099_v32 = vld [vmem:[%s3729_s2 + $0x60] sm:$0xff] }
  0x1d   :  { %2783 = vmatpush3.bf16.msra.mxu0 %v2780_v31  ;;  %2831 = vmatpush3.bf16.msra.mxu1 %v2780_v31 }
  0x1e   :  { %2785 = vmatprep.subr.bf16.mxu0 %v2784_v34  ;;  %2833 = vmatprep.subr.bf16.mxu1 %v2784_v34 }
  0x21   :  { %2787 = vmatpush3.bf16.msra.mxu0 %v2784_v34  ;;  %2835 = vmatpush3.bf16.msra.mxu1 %v2784_v34 }
  0x22   :  { %2789 = vmatprep.subr.bf16.mxu0 %v2788_v37  ;;  %2837 = vmatprep.subr.bf16.mxu1 %v2788_v37 }
  0x24   :  { %2328 = vmatmul.mubr.msk.f32.vlgmr.msra.gmra.mrb[0].mxu0 %vm297_vm0, %v313_v41  ;;  %2385 = vmatmul.mubr.msk.f32.vlgmr.msra.gmra.mrb[0].mxu1 %vm297_vm0, %v592_v42 }
  0x25   :  { %2791 = vmatpush3.bf16.msra.mxu0 %v2788_v37  ;;  %2839 = vmatpush3.bf16.msra.mxu1 %v2788_v37 }
  0x26   :  { %2793 = vmatprep.subr.bf16.mxu0 %v2792_v43  ;;  %2841 = vmatprep.subr.bf16.mxu1 %v2792_v43 }
  0x27   :  { %2346 = vmatprep.mubr.msk.f32.mxu0 %vm297_vm0, %v495_v47  ;;  %2403 = vmatprep.mubr.msk.f32.mxu1 %vm297_vm0, %v773_v48 }
  0x29   :  { %2795 = vmatpush3.bf16.msra.mxu0 %v2792_v43  ;;  %2843 = vmatpush3.bf16.msra.mxu1 %v2792_v43 }
  0x2a   :  { %2797 = vmatprep.subr.bf16.mxu0 %v2796_v49  ;;  %2845 = vmatprep.subr.bf16.mxu1 %v2796_v49 }
  0x2d   :  { %2799 = vmatpush3.bf16.msra.mxu0 %v2796_v49  ;;  %2847 = vmatpush3.bf16.msra.mxu1 %v2796_v49  ;;  %v3471_v49 = vsub.s32 0, %v3310_v46 }
  0x2e   :  { %2801 = vmatprep.subr.bf16.mxu0 %v2800_v54  ;;  %2849 = vmatprep.subr.bf16.mxu1 %v2800_v54 }
  0x31   :  { %2803 = vmatpush3.bf16.msra.mxu0 %v2800_v54  ;;  %2851 = vmatpush3.bf16.msra.mxu1 %v2800_v54 }
  0x32   :  { %2852 = vmatprep.subr.bf16.mxu0 %v3165_v2  ;;  %2876 = vmatprep.subr.bf16.mxu1 %v3165_v2 }
  0x34   :  { %2347 = vmatmul.mubr.msk.f32.vlgmr.msra.gmra.mrb[0].mxu0 %vm297_vm0, %v496_v0  ;;  %2404 = vmatmul.mubr.msk.f32.vlgmr.msra.gmra.mrb[0].mxu1 %vm297_vm0, %v774_v1  ;;  %vm3398_vm0 = vmpackc.low %vm258_vm15, %vm257_vm14 }
  0x35   :  { %2854 = vmatpush3.bf16.msk.msra.mxu0 %vm3333_vm4, %v3166_v7  ;;  %2878 = vmatpush3.bf16.msk.msra.mxu1 %vm3333_vm4, %v3166_v7  ;;  %vm3448_vm14 = vmpackc.low %vm264_vm12, %vm263_vm11 }
  0x36   :  { %2855 = vmatprep.subr.bf16.mxu0 %v3165_v2  ;;  %2879 = vmatprep.subr.bf16.mxu1 %v3165_v2 }
  0x37   :  { %2438 = vmatprep.mubr.msk.f32.mxu0 %vm3167_vm9, %v3164_v3  ;;  %2473 = vmatprep.mubr.msk.f32.mxu1 %vm3167_vm9, %v3164_v3 }
  0x39   :  { %2857 = vmatpush3.bf16.msk.msra.mxu0 %vm3349_vm7, %v3166_v7  ;;  %2881 = vmatpush3.bf16.msk.msra.mxu1 %vm3349_vm7, %v3166_v7 }
  0x3a   :  { %2858 = vmatprep.subr.bf16.mxu0 %v3165_v2  ;;  %2882 = vmatprep.subr.bf16.mxu1 %v3165_v2 }
  0x3d   :  { %2860 = vmatpush3.bf16.msk.msra.mxu0 %vm3363_vm10, %v3166_v7  ;;  %2884 = vmatpush3.bf16.msk.msra.mxu1 %vm3363_vm10, %v3166_v7 }
  0x3e   :  { %2861 = vmatprep.subr.bf16.mxu0 %v3165_v2  ;;  %2885 = vmatprep.subr.bf16.mxu1 %v3165_v2 }
  0x41   :  { %2863 = vmatpush3.bf16.msk.msra.mxu0 %vm3382_vm13, %v3166_v7  ;;  %2887 = vmatpush3.bf16.msk.msra.mxu1 %vm3382_vm13, %v3166_v7 }
  0x42   :  { %2864 = vmatprep.subr.bf16.mxu0 %v3165_v2  ;;  %2888 = vmatprep.subr.bf16.mxu1 %v3165_v2 }
  0x45   :  { %2866 = vmatpush3.bf16.msk.msra.mxu0 %vm3398_vm0, %v3166_v7  ;;  %2890 = vmatpush3.bf16.msk.msra.mxu1 %vm3398_vm0, %v3166_v7 }
  0x46   :  { %2867 = vmatprep.subr.bf16.mxu0 %v3165_v2  ;;  %2891 = vmatprep.subr.bf16.mxu1 %v3165_v2 }
  0x49   :  { %2869 = vmatpush3.bf16.msk.msra.mxu0 %vm3414_vm3, %v3166_v7  ;;  %2893 = vmatpush3.bf16.msk.msra.mxu1 %vm3414_vm3, %v3166_v7 }
  0x4a   :  { %2870 = vmatprep.subr.bf16.mxu0 %v3165_v2  ;;  %2894 = vmatprep.subr.bf16.mxu1 %v3165_v2 }
  0x4d   :  { %2872 = vmatpush3.bf16.msk.msra.mxu0 %vm3430_vm8, %v3166_v7  ;;  %2896 = vmatpush3.bf16.msk.msra.mxu1 %vm3430_vm8, %v3166_v7 }
  0x4e   :  { %2873 = vmatprep.subr.bf16.mxu0 %v3165_v2  ;;  %2897 = vmatprep.subr.bf16.mxu1 %v3165_v2 }
  0x51   :  { %2875 = vmatpush3.bf16.msk.msra.mxu0 %vm3448_vm14, %v3166_v7  ;;  %2899 = vmatpush3.bf16.msk.msra.mxu1 %vm3448_vm14, %v3166_v7 }
  0x52   :  { %2901 = vmatprep.subr.bf16.mxu0 %v2900_v14  ;;  %2997 = vmatprep.subr.bf16.mxu1 %v2900_v14 }
 0x107   :  { %v3458_v35 = vpop.f32.mrb[0].mxu0  ;;  %v3460_v36 = vpop.f32.mrb[0].mxu1 }
 0x108   :  { %v3462_v37 = vpop.f32.mrb[1].mxu0  ;;  %v3464_v38 = vpop.f32.mrb[1].mxu1 }
 0x109   :  { %v872_v39 = vadd.f32 %v3458_v35, %v3462_v37 }
 0x10b   :  { %v873_v40 = vadd.f32 %v872_v39, %v3464_v38  ;;  %v1972_v39 = vld [vmem:[%s3729_s2 + $0xe0] sm:$0xff] }
 0x10d   :  { %v874_v41 = vadd.f32 %v3460_v36, %v873_v40  ;;  %v1973_v40 = vld [vmem:[%s3729_s2 + $0xe8] sm:$0xff] }
 0x10f   :  { %v875_v42 = vrot.slane %v874_v41, 4 }
 0x111   :  { %v876_v43 = vadd.f32 %v875_v42, %v874_v41  ;;  %v2924_v41 = vpack.c.bf16 %v1973_v40, %v1972_v39  ;;  %v1974_v42 = vld [vmem:[%s3729_s2 + $0xf0] sm:$0xff] }
 0x112   :  { %v1101_v40 = vld [vmem:[%s3729_s2 + $0x70] sm:$0xff] }
 0x113   :  { %v877_v44 = vrot.slane %v876_v43, 2 }
 0x115   :  { %v878_v45 = vadd.f32 %v877_v44, %v876_v43  ;;  %v1975_v43 = vld [vmem:[%s3729_s2 + $0xf8] sm:$0xff] }
 0x116   :  { %v2928_v44 = vpack.c.bf16 %v1975_v43, %v1974_v42  ;;  %v1976_v43 = vld [vmem:[%s3729_s2 + $0x100] sm:$0xff] }
 0x117   :  { %v879_v47 = vrot.slane %v878_v45, 1 }
 0x119   :  { %v880_v48 = vadd.f32 %v879_v47, %v878_v45  ;;  %v1087_v45 = vld [vmem:[%s3729_s2] sm:$0xff]  ;;  %v1088_v47 = vld [vmem:[%s3729_s2 + $0x8] sm:$0xff] }
 0x11b   :  { %2439 = vmatmul.mubr.f32.vlgmr.msra.gmra.mrb[2].mxu0 %v880_v48  ;;  %v2932_v48 = vpack.c.bf16 %v1088_v47, %v1087_v45  ;;  %v1978_v47 = vld [vmem:[%s3729_s2 + $0x110] sm:$0xff] }
 0x11c   :  { %2903 = vmatpush3.bf16.msra.mxu0 %v2900_v14 }
 0x11d   :  { %2905 = vmatprep.subr.bf16.mxu0 %v2904_v18 }
 0x120   :  { %2907 = vmatpush3.bf16.msra.mxu0 %v2904_v18 }
 0x121   :  { %2909 = vmatprep.subr.bf16.mxu0 %v2908_v22 }
 0x124   :  { %2911 = vmatpush3.bf16.msra.mxu0 %v2908_v22 }
 0x125   :  { %2913 = vmatprep.subr.bf16.mxu0 %v2912_v25 }
 0x128   :  { %2915 = vmatpush3.bf16.msra.mxu0 %v2912_v25 }
 0x129   :  { %2917 = vmatprep.subr.bf16.mxu0 %v2916_v29 }
 0x12c   :  { %2919 = vmatpush3.bf16.msra.mxu0 %v2916_v29 }
 0x12d   :  { %2921 = vmatprep.subr.bf16.mxu0 %v2920_v33 }
 0x130   :  { %2923 = vmatpush3.bf16.msra.mxu0 %v2920_v33 }
 0x131   :  { %2925 = vmatprep.subr.bf16.mxu0 %v2924_v41 }
 0x134   :  { %2927 = vmatpush3.bf16.msra.mxu0 %v2924_v41 }
 0x135   :  { %2929 = vmatprep.subr.bf16.mxu0 %v2928_v44 }
 0x138   :  { %2931 = vmatpush3.bf16.msra.mxu0 %v2928_v44 }
 0x139   :  { %2933 = vmatprep.subr.bf16.mxu0 %v2932_v48 }
 0x1ee   :  { %v947_v50 = vpop.f32.mrb[2].mxu0 }
 0x1ef   :  { %v3473_v51 = vmul.f32 0.001953125, %v947_v50  ;;  %v2440_v52 = vpop.f32.mrb[3].mxu0 }
 0x1f1   :  { %v956_v53 = vrot.slane %v3473_v51, %v3471_v49 }
 0x1f3   :  { %v957_v54 = vsub.f32 %v3462_v37, %v956_v53  ;;  %v958_v55 = vsub.f32 %v3458_v35, %v956_v53  ;;  %v959_v56 = vsub.f32 %v3464_v38, %v956_v53  ;;  %v960_v57 = vsub.f32 %v3460_v36, %v956_v53 }
 0x1f5   :  { %v961_v58 = vmul.f32 %v957_v54, %v957_v54  ;;  %v962_v59 = vmul.f32 %v958_v55, %v958_v55  ;;  %v963_v60 = vmul.f32 %v959_v56, %v959_v56  ;;  %v964_v61 = vmul.f32 %v960_v57, %v960_v57  ;;  %v1045_v55 = vld [vmem:[%s3730_s3] sm:$0x1] }
 0x1f7   :  { %v965_v46 = vadd.f32 %v962_v59, %v961_v58  ;;  %v1049_v58 = vld [vmem:[%s3731_s4] sm:$0x1] }
 0x1f9   :  { %v966_v62 = vadd.f32 %v965_v46, %v963_v60 }
 0x1fb   :  { %v967_v63 = vadd.f32 %v966_v62, %v964_v61 }
 0x1fd   :  { %v968_v0 = vrot.slane %v967_v63, 4 }
 0x1ff   :  { %v969_v1 = vadd.f32 %v968_v0, %v967_v63 }
 0x201   :  { %v970_v5 = vrot.slane %v969_v1, 2 }
 0x203   :  { %v971_v6 = vadd.f32 %v970_v5, %v969_v1 }
 0x205   :  { %v972_v10 = vrot.slane %v971_v6, 1 }
 0x207   :  { %v973_v11 = vadd.f32 %v972_v10, %v971_v6 }
 0x209   :  { %2474 = vmatmul.mubr.f32.vlgmr.msra.gmra.mrb[2].mxu1 %v973_v11 }
 0x20a   :  { %2999 = vmatpush3.bf16.msra.mxu1 %v2900_v14 }
 0x20b   :  { %3001 = vmatprep.subr.bf16.mxu1 %v2904_v18 }
 0x20e   :  { %3003 = vmatpush3.bf16.msra.mxu1 %v2904_v18  ;;  %v1093_v18 = vld [vmem:[%s3729_s2 + $0x30] sm:$0xff] }
 0x20f   :  { %3005 = vmatprep.subr.bf16.mxu1 %v2908_v22  ;;  %v2944_v23 = vpack.c.bf16 %v1094_v19, %v1093_v18 }
 0x212   :  { %3007 = vmatpush3.bf16.msra.mxu1 %v2908_v22 }
 0x213   :  { %3009 = vmatprep.subr.bf16.mxu1 %v2912_v25 }
 0x216   :  { %3011 = vmatpush3.bf16.msra.mxu1 %v2912_v25  ;;  %v1096_v25 = vld [vmem:[%s3729_s2 + $0x48] sm:$0xff] }
 0x217   :  { %3013 = vmatprep.subr.bf16.mxu1 %v2916_v29  ;;  %v2948_v27 = vpack.c.bf16 %v1096_v25, %v1095_v24 }
 0x21a   :  { %3015 = vmatpush3.bf16.msra.mxu1 %v2916_v29  ;;  %v1098_v29 = vld [vmem:[%s3729_s2 + $0x58] sm:$0xff] }
 0x21b   :  { %3017 = vmatprep.subr.bf16.mxu1 %v2920_v33  ;;  %v2952_v30 = vpack.c.bf16 %v1098_v29, %v1097_v28 }
 0x21e   :  { %3019 = vmatpush3.bf16.msra.mxu1 %v2920_v33  ;;  %v1100_v33 = vld [vmem:[%s3729_s2 + $0x68] sm:$0xff] }
 0x21f   :  { %3021 = vmatprep.subr.bf16.mxu1 %v2924_v41  ;;  %v2956_v39 = vpack.c.bf16 %v1100_v33, %v1099_v32 }
 0x222   :  { %3023 = vmatpush3.bf16.msra.mxu1 %v2924_v41  ;;  %v1102_v41 = vld [vmem:[%s3729_s2 + $0x78] sm:$0xff] }
 0x223   :  { %3025 = vmatprep.subr.bf16.mxu1 %v2928_v44  ;;  %v2960_v42 = vpack.c.bf16 %v1102_v41, %v1101_v40 }
 0x226   :  { %3027 = vmatpush3.bf16.msra.mxu1 %v2928_v44  ;;  %v1977_v44 = vld [vmem:[%s3729_s2 + $0x108] sm:$0xff] }
 0x227   :  { %3029 = vmatprep.subr.bf16.mxu1 %v2932_v48  ;;  %v2964_v45 = vpack.c.bf16 %v1977_v44, %v1976_v43 }
 0x2dc   :  { %v1040_v50 = vpop.f32.mrb[2].mxu1 }
 0x2dd   :  { %v1044_v52 = vmul.f32 0.001953125, %v1040_v50  ;;  %v2475_v53 = vpop.f32.mrb[3].mxu1  ;;  %v1980_v50 = vld [vmem:[%s3729_s2 + $0x120] sm:$0xff] }
 0x2df   :  { %v1046_v54 = vadd.f32 1e-05, %v1044_v52 }
 0x2e1   :  { %3160 = vrsqrt.f32 %v1046_v54 }
 0x2eb   :  { %v3161_v56 = vpop.eup %3160 }
 0x2ec   :  { %v1048_v57 = vmul.f32 %v3161_v56, %v1045_v55  ;;  %v1981_v55 = vld [vmem:[%s3729_s2 + $0x128] sm:$0xff] }
 0x2ee   :  { %v1050_v59 = vmul.f32 %v1048_v57, %v3473_v51  ;;  %v1061_v60 = vrot.slane %v1048_v57, %v3471_v49  ;;  %v1089_v51 = vld [vmem:[%s3729_s2 + $0x10] sm:$0xff] }
 0x2f0   :  { %v1051_v46 = vsub.f32 %v1049_v58, %v1050_v59  ;;  %v1063_v61 = vmul.f32 %v1061_v60, %v3462_v37  ;;  %v1064_v62 = vmul.f32 %v3458_v35, %v1061_v60  ;;  %v1077_v63 = vmul.f32 %v1061_v60, %v3464_v38  ;;  %v1090_v37 = vld [vmem:[%s3729_s2 + $0x18] sm:$0xff]  ;;  %v1982_v59 = vld [vmem:[%s3729_s2 + $0x130] sm:$0xff] }
 0x2f1   :  { %v1078_v0 = vmul.f32 %v3460_v36, %v1061_v60  ;;  %v2936_v14 = vpack.c.bf16 %v1090_v37, %v1089_v51  ;;  %v1091_v36 = vld [vmem:[%s3729_s2 + $0x20] sm:$0xff]  ;;  %v2972_v58 = vpack.c.bf16 %v1981_v55, %v1980_v50  ;;  %v1983_v60 = vld [vmem:[%s3729_s2 + $0x138] sm:$0xff]  ;;  %v1990_v51 = vld [vmem:[%s3729_s2 + $0x170] sm:$0xff] }
 0x2f2   :  { %v1069_v1 = vrot.slane %v1051_v46, %v3471_v49  ;;  %v2940_v17 = vpack.c.bf16 %v1092_v15, %v1091_v36  ;;  %v2976_v46 = vpack.c.bf16 %v1983_v60, %v1982_v59  ;;  %v1991_v37 = vld [vmem:[%s3729_s2 + $0x178] sm:$0xff]  ;;  %v1829_v50 = vld [vmem:[%s3732_s5] sm:$0x1] }
 0x2f4   :  { %v1071_v5 = vadd.f32 %v1069_v1, %v1063_v61  ;;  %v1072_v6 = vadd.f32 %v1069_v1, %v1064_v62  ;;  %v1079_v10 = vadd.f32 %v1077_v63, %v1069_v1  ;;  %v1080_v11 = vadd.f32 %v1078_v0, %v1069_v1  ;;  %v1984_v61 = vld [vmem:[%s3729_s2 + $0x140] sm:$0xff]  ;;  %v1985_v62 = vld [vmem:[%s3729_s2 + $0x148] sm:$0xff]  ;;  %v1986_v0 = vld [vmem:[%s3729_s2 + $0x150] sm:$0xff] }
 0x2f5   :  { %v2980_v63 = vpack.c.bf16 %v1985_v62, %v1984_v61  ;;  %v1987_v1 = vld [vmem:[%s3729_s2 + $0x158] sm:$0xff] }
 0x2f6   :  { %v1073_v12 = vmax.f32 %v1071_v5, 0.0  ;;  %v1074_v35 = vmax.f32 %v1072_v6, 0.0  ;;  %v1081_v13 = vmax.f32 %v1079_v10, 0.0  ;;  %v1082_v38 = vmax.f32 %v1080_v11, 0.0  ;;  %v1988_v6 = vld [vmem:[%s3729_s2 + $0x160] sm:$0xff]  ;;  %v1989_v10 = vld [vmem:[%s3729_s2 + $0x168] sm:$0xff] }
 0x2f7   :  { %v2984_v5 = vpack.c.bf16 %v1987_v1, %v1986_v0  ;;  %v2988_v11 = vpack.c.bf16 %v1989_v10, %v1988_v6 }
 0x2f8   :  { %1075 = vst [vmem:[#allocation3 + $0x1] sm:$0xff] %v1073_v12  ;;  %1076 = vst [vmem:[#allocation3 + $0x9] sm:$0xff] %v1074_v35  ;;  %2508 = vmatprep.mubr.f32.mxu0 %v1073_v12  ;;  %2613 = vmatprep.mubr.f32.mxu1 %v1081_v13  ;;  %v2992_v12 = vpack.c.bf16 %v1991_v37, %v1990_v51 }
 0x2f9   :  { %1083 = vst [vmem:[#allocation3 + $0x13] sm:$0xff] %v1081_v13  ;;  %1084 = vst [vmem:[#allocation3 + $0x1b] sm:$0xff] %v1082_v38  ;;  %2509 = vmatmul.mubr.f32.vlgmr.msra.gmra.mrb[4].mxu0 %v1074_v35  ;;  %2614 = vmatmul.mubr.f32.vlgmr.msra.gmra.mrb[4].mxu1 %v1082_v38 }
 0x2fa   :  { %2935 = vmatpush3.bf16.msra.mxu0 %v2932_v48  ;;  %3031 = vmatpush3.bf16.msra.mxu1 %v2932_v48  ;;  %v1979_v48 = vld [vmem:[%s3729_s2 + $0x118] sm:$0xff] }
 0x2fb   :  { %2937 = vmatprep.subr.bf16.mxu0 %v2936_v14  ;;  %3033 = vmatprep.subr.bf16.mxu1 %v2936_v14  ;;  %v2968_v54 = vpack.c.bf16 %v1979_v48, %v1978_v47 }
 0x2fe   :  { %2939 = vmatpush3.bf16.msra.mxu0 %v2936_v14  ;;  %3035 = vmatpush3.bf16.msra.mxu1 %v2936_v14 }
 0x2ff   :  { %v1085_v20 = vld [vmem:[#allocation3] sm:$0xff]  ;;  %2941 = vmatprep.subr.bf16.mxu0 %v2940_v17  ;;  %3037 = vmatprep.subr.bf16.mxu1 %v2940_v17  ;;  %v1086_v52 = vld [vmem:[#allocation3 + $0x8] sm:$0xff] }
 0x300   :  { %v1370_v22 = vld [vmem:[#allocation3 + $0x12] sm:$0xff]  ;;  %2543 = vmatprep.mubr.f32.mxu0 %v1085_v20  ;;  %v1371_v53 = vld [vmem:[#allocation3 + $0x1a] sm:$0xff]  ;;  %v1272_v56 = vld [vmem:[#allocation3 + $0x2] sm:$0xff] }
 0x301   :  { %2648 = vmatprep.mubr.f32.mxu1 %v1370_v22  ;;  %v1556_v57 = vld [vmem:[#allocation3 + $0x14] sm:$0xff]  ;;  %v1273_v35 = vld [vmem:[#allocation3 + $0xa] sm:$0xff]  ;;  %v1557_v13 = vld [vmem:[#allocation3 + $0x1c] sm:$0xff] }
 0x302   :  { %2943 = vmatpush3.bf16.msra.mxu0 %v2940_v17  ;;  %3039 = vmatpush3.bf16.msra.mxu1 %v2940_v17 }
 0x303   :  { %2945 = vmatprep.subr.bf16.mxu0 %v2944_v23  ;;  %3041 = vmatprep.subr.bf16.mxu1 %v2944_v23 }
 0x306   :  { %2947 = vmatpush3.bf16.msra.mxu0 %v2944_v23  ;;  %3043 = vmatpush3.bf16.msra.mxu1 %v2944_v23 }
 0x307   :  { %2949 = vmatprep.subr.bf16.mxu0 %v2948_v27  ;;  %3045 = vmatprep.subr.bf16.mxu1 %v2948_v27 }
 0x30a   :  { %2951 = vmatpush3.bf16.msra.mxu0 %v2948_v27  ;;  %3047 = vmatpush3.bf16.msra.mxu1 %v2948_v27 }
 0x30b   :  { %2953 = vmatprep.subr.bf16.mxu0 %v2952_v30  ;;  %3049 = vmatprep.subr.bf16.mxu1 %v2952_v30 }
 0x30e   :  { %2955 = vmatpush3.bf16.msra.mxu0 %v2952_v30  ;;  %3051 = vmatpush3.bf16.msra.mxu1 %v2952_v30 }
 0x30f   :  { %2957 = vmatprep.subr.bf16.mxu0 %v2956_v39  ;;  %3053 = vmatprep.subr.bf16.mxu1 %v2956_v39 }
 0x312   :  { %2959 = vmatpush3.bf16.msra.mxu0 %v2956_v39  ;;  %3055 = vmatpush3.bf16.msra.mxu1 %v2956_v39 }
 0x313   :  { %2961 = vmatprep.subr.bf16.mxu0 %v2960_v42  ;;  %3057 = vmatprep.subr.bf16.mxu1 %v2960_v42 }
 0x316   :  { %2963 = vmatpush3.bf16.msra.mxu0 %v2960_v42  ;;  %3059 = vmatpush3.bf16.msra.mxu1 %v2960_v42 }
 0x317   :  { %2965 = vmatprep.subr.bf16.mxu0 %v2964_v45  ;;  %3061 = vmatprep.subr.bf16.mxu1 %v2964_v45 }
 0x319   :  { %2544 = vmatmul.mubr.f32.vlgmr.msra.gmra.mrb[4].mxu0 %v1086_v52  ;;  %2649 = vmatmul.mubr.f32.vlgmr.msra.gmra.mrb[4].mxu1 %v1371_v53 }
 0x31a   :  { %2967 = vmatpush3.bf16.msra.mxu0 %v2964_v45  ;;  %2578 = vmatprep.mubr.f32.mxu0 %v1272_v56 }
 0x31b   :  { %3063 = vmatpush3.bf16.msra.mxu1 %v2964_v45  ;;  %2683 = vmatprep.mubr.f32.mxu1 %v1556_v57 }
 0x31c   :  { %2969 = vmatprep.subr.bf16.mxu0 %v2968_v54  ;;  %3065 = vmatprep.subr.bf16.mxu1 %v2968_v54 }
 0x31e   :  { %2971 = vmatpush3.bf16.msra.mxu0 %v2968_v54 }
 0x31f   :  { %3067 = vmatpush3.bf16.msra.mxu1 %v2968_v54  ;;  %2973 = vmatprep.subr.bf16.mxu0 %v2972_v58  ;;  %v1833_v54 = vld [vmem:[%s3733_s6] sm:$0x1] }
 0x320   :  { %3069 = vmatprep.subr.bf16.mxu1 %v2972_v58 }
 0x322   :  { %2975 = vmatpush3.bf16.msra.mxu0 %v2972_v58 }
 0x323   :  { %3071 = vmatpush3.bf16.msra.mxu1 %v2972_v58  ;;  %2977 = vmatprep.subr.bf16.mxu0 %v2976_v46 }
 0x324   :  { %3073 = vmatprep.subr.bf16.mxu1 %v2976_v46 }
 0x326   :  { %2979 = vmatpush3.bf16.msra.mxu0 %v2976_v46 }
 0x327   :  { %3075 = vmatpush3.bf16.msra.mxu1 %v2976_v46  ;;  %2981 = vmatprep.subr.bf16.mxu0 %v2980_v63 }
 0x328   :  { %3077 = vmatprep.subr.bf16.mxu1 %v2980_v63 }
 0x32a   :  { %2983 = vmatpush3.bf16.msra.mxu0 %v2980_v63 }
 0x32b   :  { %3079 = vmatpush3.bf16.msra.mxu1 %v2980_v63  ;;  %2985 = vmatprep.subr.bf16.mxu0 %v2984_v5 }
 0x32c   :  { %3081 = vmatprep.subr.bf16.mxu1 %v2984_v5 }
 0x32e   :  { %2987 = vmatpush3.bf16.msra.mxu0 %v2984_v5 }
 0x32f   :  { %3083 = vmatpush3.bf16.msra.mxu1 %v2984_v5  ;;  %2989 = vmatprep.subr.bf16.mxu0 %v2988_v11 }
 0x330   :  { %3085 = vmatprep.subr.bf16.mxu1 %v2988_v11 }
 0x332   :  { %2991 = vmatpush3.bf16.msra.mxu0 %v2988_v11 }
 0x333   :  { %3087 = vmatpush3.bf16.msra.mxu1 %v2988_v11  ;;  %2993 = vmatprep.subr.bf16.mxu0 %v2992_v12 }
 0x334   :  { %3089 = vmatprep.subr.bf16.mxu1 %v2992_v12 }
 0x336   :  { %2995 = vmatpush3.bf16.msra.mxu0 %v2992_v12 }
 0x337   :  { %3091 = vmatpush3.bf16.msra.mxu1 %v2992_v12  ;;  %3092 = vmatprep.subr.bf16.mxu0 %v3165_v2 }
 0x338   :  { %3116 = vmatprep.subr.bf16.mxu1 %v3165_v2 }
 0x339   :  { %2579 = vmatmul.mubr.f32.vlgmr.msra.gmra.mrb[4].mxu0 %v1273_v35 }
 0x33a   :  { %2684 = vmatmul.mubr.f32.vlgmr.msra.gmra.mrb[4].mxu1 %v1557_v13  ;;  %3094 = vmatpush3.bf16.msk.msra.mxu0 %vm3333_vm4, %v3166_v7 }
 0x33b   :  { %3095 = vmatprep.subr.bf16.mxu0 %v3165_v2  ;;  %2718 = vmatprep.mubr.msk.f32.mxu0 %vm3167_vm9, %v3164_v3 }
 0x33c   :  { %3118 = vmatpush3.bf16.msk.msra.mxu1 %vm3333_vm4, %v3166_v7  ;;  %2753 = vmatprep.mubr.msk.f32.mxu1 %vm3167_vm9, %v3164_v3 }
 0x33d   :  { %3119 = vmatprep.subr.bf16.mxu1 %v3165_v2 }
 0x33e   :  { %3097 = vmatpush3.bf16.msk.msra.mxu0 %vm3349_vm7, %v3166_v7 }
 0x33f   :  { %3098 = vmatprep.subr.bf16.mxu0 %v3165_v2 }
 0x340   :  { %3121 = vmatpush3.bf16.msk.msra.mxu1 %vm3349_vm7, %v3166_v7 }
 0x341   :  { %3122 = vmatprep.subr.bf16.mxu1 %v3165_v2 }
 0x342   :  { %3100 = vmatpush3.bf16.msk.msra.mxu0 %vm3363_vm10, %v3166_v7 }
 0x343   :  { %3101 = vmatprep.subr.bf16.mxu0 %v3165_v2 }
 0x344   :  { %3124 = vmatpush3.bf16.msk.msra.mxu1 %vm3363_vm10, %v3166_v7 }
 0x345   :  { %3125 = vmatprep.subr.bf16.mxu1 %v3165_v2 }
 0x346   :  { %3103 = vmatpush3.bf16.msk.msra.mxu0 %vm3382_vm13, %v3166_v7 }
 0x347   :  { %3104 = vmatprep.subr.bf16.mxu0 %v3165_v2 }
 0x348   :  { %3127 = vmatpush3.bf16.msk.msra.mxu1 %vm3382_vm13, %v3166_v7 }
 0x349   :  { %3128 = vmatprep.subr.bf16.mxu1 %v3165_v2 }
 0x34a   :  { %3106 = vmatpush3.bf16.msk.msra.mxu0 %vm3398_vm0, %v3166_v7 }
 0x34b   :  { %3107 = vmatprep.subr.bf16.mxu0 %v3165_v2 }
 0x34c   :  { %3130 = vmatpush3.bf16.msk.msra.mxu1 %vm3398_vm0, %v3166_v7 }
 0x34d   :  { %3131 = vmatprep.subr.bf16.mxu1 %v3165_v2 }
 0x34e   :  { %3109 = vmatpush3.bf16.msk.msra.mxu0 %vm3414_vm3, %v3166_v7 }
 0x34f   :  { %3110 = vmatprep.subr.bf16.mxu0 %v3165_v2 }
 0x350   :  { %3133 = vmatpush3.bf16.msk.msra.mxu1 %vm3414_vm3, %v3166_v7 }
 0x351   :  { %3134 = vmatprep.subr.bf16.mxu1 %v3165_v2 }
 0x352   :  { %3112 = vmatpush3.bf16.msk.msra.mxu0 %vm3430_vm8, %v3166_v7 }
 0x353   :  { %3113 = vmatprep.subr.bf16.mxu0 %v3165_v2 }
 0x354   :  { %3136 = vmatpush3.bf16.msk.msra.mxu1 %vm3430_vm8, %v3166_v7 }
 0x355   :  { %3137 = vmatprep.subr.bf16.mxu1 %v3165_v2 }
 0x356   :  { %3115 = vmatpush3.bf16.msk.msra.mxu0 %vm3448_vm14, %v3166_v7 }
 0x358   :  { %3139 = vmatpush3.bf16.msk.msra.mxu1 %vm3448_vm14, %v3166_v7 }
 0x40c   :  { %v2580_v3 = vpop.f32.mrb[4].mxu0 }
 0x40d   :  { %v2685_v4 = vpop.f32.mrb[4].mxu1  ;;  %v1357_v8 = vpop.f32.mrb[5].mxu0 }
 0x40e   :  { %v1657_v9 = vadd.f32 %v2580_v3, %v1357_v8  ;;  %v1640_v16 = vpop.f32.mrb[5].mxu1 }
 0x410   :  { %v1658_v21 = vadd.f32 %v1657_v9, %v1640_v16 }
 0x412   :  { %v1659_v26 = vadd.f32 %v2685_v4, %v1658_v21 }
 0x414   :  { %v1660_v38 = vrot.slane %v1659_v26, 4 }
 0x416   :  { %v1661_v31 = vadd.f32 %v1660_v38, %v1659_v26 }
 0x418   :  { %v1662_v14 = vrot.slane %v1661_v31, 2 }
 0x41a   :  { %v1663_v36 = vadd.f32 %v1662_v14, %v1661_v31 }
 0x41c   :  { %v1664_v2 = vrot.slane %v1663_v36, 1 }
 0x41e   :  { %v1665_v15 = vadd.f32 %v1664_v2, %v1663_v36 }
 0x420   :  { %2719 = vmatmul.mubr.f32.vlgmr.msra.gmra.mrb[6].mxu0 %v1665_v15 }
 0x4f3   :  { %v1732_v17 = vpop.f32.mrb[6].mxu0 }
 0x4f4   :  { %v1736_v18 = vmul.f32 0.001953125, %v1732_v17  ;;  %v2720_v19 = vpop.f32.mrb[7].mxu0 }
 0x4f6   :  { %v1740_v34 = vrot.slane %v1736_v18, %v3471_v49 }
 0x4f8   :  { %v1741_v7 = vsub.f32 %v1357_v8, %v1740_v34  ;;  %v1742_v20 = vsub.f32 %v2580_v3, %v1740_v34  ;;  %v1743_v22 = vsub.f32 %v1640_v16, %v1740_v34  ;;  %v1744_v23 = vsub.f32 %v2685_v4, %v1740_v34 }
 0x4fa   :  { %v1745_v24 = vmul.f32 %v1741_v7, %v1741_v7  ;;  %v1746_v25 = vmul.f32 %v1742_v20, %v1742_v20  ;;  %v1747_v27 = vmul.f32 %v1743_v22, %v1743_v22  ;;  %v1748_v29 = vmul.f32 %v1744_v23, %v1744_v23 }
 0x4fc   :  { %v1749_v28 = vadd.f32 %v1746_v25, %v1745_v24 }
 0x4fe   :  { %v1750_v30 = vadd.f32 %v1749_v28, %v1747_v27 }
 0x500   :  { %v1751_v32 = vadd.f32 %v1750_v30, %v1748_v29 }
 0x502   :  { %v1752_v33 = vrot.slane %v1751_v32, 4 }
 0x504   :  { %v1753_v39 = vadd.f32 %v1752_v33, %v1751_v32 }
 0x506   :  { %v1754_v40 = vrot.slane %v1753_v39, 2 }
 0x508   :  { %v1755_v41 = vadd.f32 %v1754_v40, %v1753_v39 }
 0x50a   :  { %v1756_v42 = vrot.slane %v1755_v41, 1 }
 0x50c   :  { %v1757_v43 = vadd.f32 %v1756_v42, %v1755_v41 }
 0x50e   :  { %2754 = vmatmul.mubr.f32.vlgmr.msra.gmra.mrb[6].mxu1 %v1757_v43 }
 0x5e1   :  { %v1824_v44 = vpop.f32.mrb[6].mxu1 }
 0x5e2   :  { %v1828_v45 = vmul.f32 0.001953125, %v1824_v44  ;;  %v2755_v47 = vpop.f32.mrb[7].mxu1 }
 0x5e4   :  { %v1830_v48 = vadd.f32 1e-05, %v1828_v45 }
 0x5e6   :  { %3162 = vrsqrt.f32 %v1830_v48 }
 0x5f0   :  { %v3163_v52 = vpop.eup %3162 }
 0x5f1   :  { %v1832_v53 = vmul.f32 %v3163_v52, %v1829_v50 }
 0x5f3   :  { %v1834_v55 = vmul.f32 %v1832_v53, %v1736_v18  ;;  %v1840_v56 = vrot.slane %v1832_v53, %v3471_v49 }
 0x5f5   :  { %v1835_v57 = vsub.f32 %v1833_v54, %v1834_v55  ;;  %v1842_v58 = vmul.f32 %v1840_v56, %v1357_v8  ;;  %v1843_v59 = vmul.f32 %v2580_v3, %v1840_v56  ;;  %v1844_v60 = vmul.f32 %v1840_v56, %v1640_v16 }
 0x5f6   :  { %v1845_v46 = vmul.f32 %v2685_v4, %v1840_v56 }
 0x5f7   :  { %v1850_v61 = vrot.slane %v1835_v57, %v3471_v49 }
 0x5f9   :  { %v1852_v62 = vadd.f32 %v1850_v61, %v1842_v58  ;;  %v1853_v63 = vadd.f32 %v1850_v61, %v1843_v59  ;;  %v1854_v0 = vadd.f32 %v1850_v61, %v1844_v60  ;;  %v1855_v1 = vadd.f32 %v1850_v61, %v1845_v46 }
 0x5fb   :  { %v1856_v5 = vmax.f32 %v1852_v62, 0.0  ;;  %v1857_v6 = vmax.f32 %v1853_v63, 0.0  ;;  %v1858_v10 = vmax.f32 %v1854_v0, 0.0  ;;  %v1859_v11 = vmax.f32 %v1855_v1, 0.0 }
 0x5fd   :  { %1860 = vst [vmem:[%s3734_s7] sm:$0xff] %v1856_v5  ;;  %1861 = vst [vmem:[%s3734_s7 + $0x8] sm:$0xff] %v1857_v6 }
 0x5fe   :  { %1862 = vst [vmem:[%s3734_s7 + $0x10] sm:$0xff] %v1858_v10  ;;  %1863 = vst [vmem:[%s3734_s7 + $0x18] sm:$0xff] %v1859_v11 }

</bundles_post_ra>
